<compile_context>
chip_gen: v7x
topology: tpu7x:2x2x1
jax: 0.10.0
libtpu: 0.0.40
codegen_flags: <defaults>
</compile_context>

<pallas_src>
import numpy as np
import jax
import jax.numpy as jnp
from jax.experimental import pallas as pl
from jax.experimental.pallas import tpu as pltpu


def _round_up(v, m):
    return (v + m - 1) // m * m


def _pick_tile(dim, candidates):
    for t in candidates:
        if t <= dim and dim % t == 0:
            return t
    return dim


# ---------------------------------------------------------------------------
# Fused kernel:  x[idx] gather  +  adj[idx, :][:, idx]  (one-hot column select)
# Grid = (S_rows // ROWS  [parallel],  N_pad // TK  [arbitrary/reduction])
# ---------------------------------------------------------------------------
def _fused_gather_select_kernel(idx_rows_ref,      # SMEM scalar prefetch (S_rows,)
                                idx_cols_ref,      # VMEM (1, S_pad) int32
                                x_hbm, adj_hbm,    # HBM refs (memory_space=ANY)
                                xo_ref, ao_ref,    # outputs (ROWS,F), (ROWS,S_pad)
                                xbuf, abuf, xsem, asem):
    i = pl.program_id(0)
    k = pl.program_id(1)
    ROWS, S_pad = ao_ref.shape
    TK = abuf.shape[1]
    base = i * ROWS
    col0 = pl.multiple_of(k * TK, TK)

    # ---- issue this step's adjacency-row gather DMAs (ROWS rows x TK cols) ----
    for r in range(ROWS):
        row = idx_rows_ref[base + r]
        pltpu.make_async_copy(
            adj_hbm.at[pl.ds(row, 1), pl.ds(col0, TK)],
            abuf.at[pl.ds(r, 1)],
            asem.at[r],
        ).start()

    # ---- once per row block: gather the feature rows & zero the accumulator --
    @pl.when(k == 0)
    def _issue_x_and_init():
        for r in range(ROWS):
            row = idx_rows_ref[base + r]
            pltpu.make_async_copy(
                x_hbm.at[pl.ds(row, 1)],
                xbuf.at[pl.ds(r, 1)],
                xsem.at[r],
            ).start()
        ao_ref[...] = jnp.zeros_like(ao_ref)

    # ---- build the (TK, S_pad) bf16 column one-hot while DMAs are in flight --
    # (built directly in contraction-major orientation -> no transpose; padded
    #  column ids are -1 so padded output columns are exactly zero)
    col_ids = jax.lax.broadcasted_iota(jnp.int32, (TK, S_pad), 0) + col0
    onehot = (col_ids == idx_cols_ref[...]).astype(jnp.bfloat16)

    # ---- drain adjacency rows, accumulate rows @ onehot on the MXU -----------
    for r in range(ROWS):
        pltpu.make_async_copy(
            adj_hbm.at[pl.ds(0, 1), pl.ds(0, TK)],
            abuf.at[pl.ds(r, 1)],
            asem.at[r],
        ).wait()
    ao_ref[...] += jnp.dot(abuf[...].astype(jnp.bfloat16), onehot,
                           preferred_element_type=jnp.float32)

    # ---- drain the feature-row DMAs and emit the x block ---------------------
    @pl.when(k == 0)
    def _drain_x():
        for r in range(ROWS):
            pltpu.make_async_copy(
                x_hbm.at[pl.ds(0, 1)],
                xbuf.at[pl.ds(r, 1)],
                xsem.at[r],
            ).wait()
        xo_ref[...] = xbuf[...]


def fused_gather_select(idx_rows, idx_cols, x, adj, *, rows, tk, s_pad):
    S_rows = idx_rows.shape[0]
    N, F = x.shape
    N_pad = adj.shape[1]
    num_i = S_rows // rows
    num_k = N_pad // tk

    grid_spec = pltpu.PrefetchScalarGridSpec(
        num_scalar_prefetch=1,
        grid=(num_i, num_k),
        in_specs=[
            pl.BlockSpec((1, s_pad), lambda i, k, idx_ref: (0, 0)),   # idx_cols
            pl.BlockSpec(memory_space=pl.ANY),                        # x (HBM)
            pl.BlockSpec(memory_space=pl.ANY),                        # adj (HBM)
        ],
        out_specs=[
            pl.BlockSpec((rows, F), lambda i, k, idx_ref: (i, 0)),
            pl.BlockSpec((rows, s_pad), lambda i, k, idx_ref: (i, 0)),
        ],
        scratch_shapes=[
            pltpu.VMEM((rows, F), x.dtype),
            pltpu.VMEM((rows, tk), adj.dtype),
            pltpu.SemaphoreType.DMA((rows,)),
            pltpu.SemaphoreType.DMA((rows,)),
        ],
    )
    return pl.pallas_call(
        _fused_gather_select_kernel,
        out_shape=(
            jax.ShapeDtypeStruct((S_rows, F), x.dtype),
            jax.ShapeDtypeStruct((S_rows, s_pad), jnp.float32),
        ),
        grid_spec=grid_spec,
        compiler_params=pltpu.CompilerParams(
            dimension_semantics=("parallel", "arbitrary")),
    )(idx_rows, idx_cols, x, adj)


# ---------------------------------------------------------------------------
# Setup-time helpers (run once per graph, hoisted out of the sampling path)
# ---------------------------------------------------------------------------
def build_dense_adjacency(edge_index, num_nodes):
    """Dense 0/1 adjacency, columns padded to a lane-dense multiple of 128.
    Stands in for to_scipy_sparse_matrix().tocsr().  Built ONCE at setup."""
    n_pad = _round_up(num_nodes, 128)
    adj = jnp.zeros((num_nodes, n_pad), jnp.float32)
    return adj.at[edge_index[0], edge_index[1]].set(1.0)


# ---------------------------------------------------------------------------
# Wrapper mirroring G_Sample_induct.forward
# ---------------------------------------------------------------------------
def g_sample_induct(x, y, adj, sample_size, edge_max, key):
    """adj:      prebuilt dense adjacency (build_dense_adjacency, setup-time).
    edge_max: STATIC Python int == int(edge_index.max()), computed at setup.

    Inherited quirk (kept on purpose to match the PyTorch module exactly):
    torch.randperm(edge_index.max()) uses max, not max+1, so the highest-index
    node can never be sampled and at most edge_max rows are produced."""
    N, F = x.shape
    N_pad = adj.shape[1]
    S = int(min(sample_size, edge_max))

    perm = jax.random.permutation(key, edge_max)
    idx = perm[:S].astype(jnp.int32)          # idx values are in [0, N)

    ROWS = min(32, _round_up(S, 8))           # sublane-dense row batch
    S_rows = _round_up(S, ROWS)
    S_pad = _round_up(S, 128) if S <= 128 else _round_up(S, 256)
    TK = _pick_tile(N_pad, (2048, 1024, 512, 256, 128))

    # Row-gather addresses (padded rows re-fetch node 0, sliced off below);
    # column one-hot ids (padded columns are -1 -> all-zero, sliced off).
    idx_rows = jnp.zeros((S_rows,), jnp.int32).at[:S].set(idx)
    idx_cols = jnp.full((1, S_pad), -1, jnp.int32).at[0, :S].set(idx)

    x_pad, adj_pad = fused_gather_select(idx_rows, idx_cols, x, adj,
                                         rows=ROWS, tk=TK, s_pad=S_pad)
    x_sampled = x_pad[:S]
    adj_sub = adj_pad[:S, :S]
    y_sampled = y[idx]                        # tiny 1-D gather; XLA handles it

    # TODO(synk): from_scipy_sparse_matrix (nonzero -> edge list) has a
    # data-dependent output shape; extracted on the host in __main__.
    return x_sampled, y_sampled, adj_sub, idx


if __name__ == "__main__":
    key = jax.random.PRNGKey(0)
    k_x, k_y, k_e, k_perm = jax.random.split(key, 4)

    N, F, E = 16, 128, 40
    sample_size = 8

    x = jax.random.normal(k_x, (N, F), dtype=jnp.float32)
    y = jax.random.randint(k_y, (N,), 0, 4, dtype=jnp.int32)
    edge_index = jax.random.randint(k_e, (2, E), 0, N, dtype=jnp.int32)
    # make sure node N-1 appears so edge_index.max() == N-1 deterministically
    edge_index = jnp.concatenate(
        [edge_index, jnp.array([[N - 1], [0]], dtype=jnp.int32)], axis=1)

    # ---- setup-time work (once per graph), hoisted out of the sample path ----
    edge_max = int(np.asarray(edge_index).max())
    adj = build_dense_adjacency(edge_index, N)

    # ---- sampling path (the Pallas kernel) ------------------------------------
    x_s, y_s, adj_sub, idx = g_sample_induct(
        x, y, adj, sample_size, edge_max, k_perm)
    jax.block_until_ready((x_s, y_s, adj_sub))

    # reference check (pure JAX gathers)
    adj_ref = jnp.zeros((N, N), jnp.float32).at[
        edge_index[0], edge_index[1]].set(1.0)
    np.testing.assert_allclose(np.asarray(x_s), np.asarray(x[idx]), rtol=1e-6)
    np.testing.assert_array_equal(np.asarray(y_s), np.asarray(y[idx]))
    np.testing.assert_allclose(
        np.asarray(adj_sub), np.asarray(adj_ref[idx][:, idx]), rtol=1e-6)

    # host-side edge list extraction (dynamic shape -> numpy on host)
    src, dst = np.nonzero(np.asarray(adj_sub))
    edge_index_sampled = np.stack([src, dst], axis=0)
    _ = edge_index_sampled  # part of the returned Data object in the reference

    print("KERNEL_OK")
</pallas_src>

<mosaic_0001>
module attributes {stable_mosaic.version = 11 : i64} {
  func.func @_fused_gather_select_kernel(%arg0: i32, %arg1: i32, %arg2: memref<8xi32, #tpu.memory_space<smem>>, %arg3: memref<1x128xi32, #tpu.memory_space<vmem>>, %arg4: memref<16x128xf32, #tpu.memory_space<any>>, %arg5: memref<16x128xf32, #tpu.memory_space<any>>, %arg6: memref<8x128xf32, #tpu.memory_space<vmem>>, %arg7: memref<8x128xf32, #tpu.memory_space<vmem>>, %arg8: memref<8x128xf32, #tpu.memory_space<vmem>>, %arg9: memref<8x128xf32, #tpu.memory_space<vmem>>, %arg10: memref<8x!tpu.dma_semaphore, #tpu.memory_space<semaphore_mem>>, %arg11: memref<8x!tpu.dma_semaphore, #tpu.memory_space<semaphore_mem>>) attributes {dimension_semantics = [#tpu.dimension_semantics<parallel>, #tpu.dimension_semantics<arbitrary>], iteration_bounds = array<i64: 1, 1>, scalar_prefetch = 1 : i64, scratch_operands = 4 : i64, tpu.core_type = #tpu.core_type<tc>, window_params = [{pipeline_mode = #tpu.pipeline_mode<synchronous>, transform_indices = @transform_0, window_bounds = array<i64: 1, 128>}, {}, {}, {transform_indices = @transform_3, window_bounds = array<i64: 8, 128>}, {transform_indices = @transform_4, window_bounds = array<i64: 8, 128>}]} {
    %c8_i32 = arith.constant 8 : i32
    %0 = arith.muli %arg0, %c8_i32 : i32
    %c128_i32 = arith.constant 128 : i32
    %1 = arith.muli %arg1, %c128_i32 : i32
    %2 = tpu.assume_multiple %1, 128 : i32
    %c0_i32 = arith.constant 0 : i32
    %3 = arith.addi %0, %c0_i32 : i32
    %4 = arith.index_cast %3 : i32 to index
    %5 = memref.load %arg2[%4] : memref<8xi32, #tpu.memory_space<smem>>
    %c0_i32_0 = arith.constant 0 : i32
    %6 = tpu.memref_slice %arg5[%5, %2] : memref<16x128xf32, #tpu.memory_space<any>> -> memref<1x128xf32, #tpu.memory_space<any>>
    %c0_i32_1 = arith.constant 0 : i32
    %c0_i32_2 = arith.constant 0 : i32
    %7 = tpu.memref_slice %arg9[%c0_i32_1, %c0_i32_2] : memref<8x128xf32, #tpu.memory_space<vmem>> -> memref<1x128xf32, #tpu.memory_space<vmem>>
    %8 = tpu.memref_slice %arg11[%c0_i32_0] : memref<8x!tpu.dma_semaphore, #tpu.memory_space<semaphore_mem>> -> memref<1x!tpu.dma_semaphore, #tpu.memory_space<semaphore_mem>>
    %9 = tpu.memref_squeeze %8 : memref<1x!tpu.dma_semaphore, #tpu.memory_space<semaphore_mem>> -> memref<!tpu.dma_semaphore, #tpu.memory_space<semaphore_mem>>
    tpu.enqueue_dma source(%6 : memref<1x128xf32, #tpu.memory_space<any>>) target(%7 : memref<1x128xf32, #tpu.memory_space<vmem>>) target_semaphore(%9 : memref<!tpu.dma_semaphore, #tpu.memory_space<semaphore_mem>>)
    %c1_i32 = arith.constant 1 : i32
    %10 = arith.addi %0, %c1_i32 : i32
    %11 = arith.index_cast %10 : i32 to index
    %12 = memref.load %arg2[%11] : memref<8xi32, #tpu.memory_space<smem>>
    %c1_i32_3 = arith.constant 1 : i32
    %13 = tpu.memref_slice %arg5[%12, %2] : memref<16x128xf32, #tpu.memory_space<any>> -> memref<1x128xf32, #tpu.memory_space<any>>
    %c1_i32_4 = arith.constant 1 : i32
    %c0_i32_5 = arith.constant 0 : i32
    %14 = tpu.memref_slice %arg9[%c1_i32_4, %c0_i32_5] : memref<8x128xf32, #tpu.memory_space<vmem>> -> memref<1x128xf32, #tpu.memory_space<vmem>>
    %15 = tpu.memref_slice %arg11[%c1_i32_3] : memref<8x!tpu.dma_semaphore, #tpu.memory_space<semaphore_mem>> -> memref<1x!tpu.dma_semaphore, #tpu.memory_space<semaphore_mem>>
    %16 = tpu.memref_squeeze %15 : memref<1x!tpu.dma_semaphore, #tpu.memory_space<semaphore_mem>> -> memref<!tpu.dma_semaphore, #tpu.memory_space<semaphore_mem>>
    tpu.enqueue_dma source(%13 : memref<1x128xf32, #tpu.memory_space<any>>) target(%14 : memref<1x128xf32, #tpu.memory_space<vmem>>) target_semaphore(%16 : memref<!tpu.dma_semaphore, #tpu.memory_space<semaphore_mem>>)
    %c2_i32 = arith.constant 2 : i32
    %17 = arith.addi %0, %c2_i32 : i32
    %18 = arith.index_cast %17 : i32 to index
    %19 = memref.load %arg2[%18] : memref<8xi32, #tpu.memory_space<smem>>
    %c2_i32_6 = arith.constant 2 : i32
    %20 = tpu.memref_slice %arg5[%19, %2] : memref<16x128xf32, #tpu.memory_space<any>> -> memref<1x128xf32, #tpu.memory_space<any>>
    %c2_i32_7 = arith.constant 2 : i32
    %c0_i32_8 = arith.constant 0 : i32
    %21 = tpu.memref_slice %arg9[%c2_i32_7, %c0_i32_8] : memref<8x128xf32, #tpu.memory_space<vmem>> -> memref<1x128xf32, #tpu.memory_space<vmem>>
    %22 = tpu.memref_slice %arg11[%c2_i32_6] : memref<8x!tpu.dma_semaphore, #tpu.memory_space<semaphore_mem>> -> memref<1x!tpu.dma_semaphore, #tpu.memory_space<semaphore_mem>>
    %23 = tpu.memref_squeeze %22 : memref<1x!tpu.dma_semaphore, #tpu.memory_space<semaphore_mem>> -> memref<!tpu.dma_semaphore, #tpu.memory_space<semaphore_mem>>
    tpu.enqueue_dma source(%20 : memref<1x128xf32, #tpu.memory_space<any>>) target(%21 : memref<1x128xf32, #tpu.memory_space<vmem>>) target_semaphore(%23 : memref<!tpu.dma_semaphore, #tpu.memory_space<semaphore_mem>>)
    %c3_i32 = arith.constant 3 : i32
    %24 = arith.addi %0, %c3_i32 : i32
    %25 = arith.index_cast %24 : i32 to index
    %26 = memref.load %arg2[%25] : memref<8xi32, #tpu.memory_space<smem>>
    %c3_i32_9 = arith.constant 3 : i32
    %27 = tpu.memref_slice %arg5[%26, %2] : memref<16x128xf32, #tpu.memory_space<any>> -> memref<1x128xf32, #tpu.memory_space<any>>
    %c3_i32_10 = arith.constant 3 : i32
    %c0_i32_11 = arith.constant 0 : i32
    %28 = tpu.memref_slice %arg9[%c3_i32_10, %c0_i32_11] : memref<8x128xf32, #tpu.memory_space<vmem>> -> memref<1x128xf32, #tpu.memory_space<vmem>>
    %29 = tpu.memref_slice %arg11[%c3_i32_9] : memref<8x!tpu.dma_semaphore, #tpu.memory_space<semaphore_mem>> -> memref<1x!tpu.dma_semaphore, #tpu.memory_space<semaphore_mem>>
    %30 = tpu.memref_squeeze %29 : memref<1x!tpu.dma_semaphore, #tpu.memory_space<semaphore_mem>> -> memref<!tpu.dma_semaphore, #tpu.memory_space<semaphore_mem>>
    tpu.enqueue_dma source(%27 : memref<1x128xf32, #tpu.memory_space<any>>) target(%28 : memref<1x128xf32, #tpu.memory_space<vmem>>) target_semaphore(%30 : memref<!tpu.dma_semaphore, #tpu.memory_space<semaphore_mem>>)
    %c4_i32 = arith.constant 4 : i32
    %31 = arith.addi %0, %c4_i32 : i32
    %32 = arith.index_cast %31 : i32 to index
    %33 = memref.load %arg2[%32] : memref<8xi32, #tpu.memory_space<smem>>
    %c4_i32_12 = arith.constant 4 : i32
    %34 = tpu.memref_slice %arg5[%33, %2] : memref<16x128xf32, #tpu.memory_space<any>> -> memref<1x128xf32, #tpu.memory_space<any>>
    %c4_i32_13 = arith.constant 4 : i32
    %c0_i32_14 = arith.constant 0 : i32
    %35 = tpu.memref_slice %arg9[%c4_i32_13, %c0_i32_14] : memref<8x128xf32, #tpu.memory_space<vmem>> -> memref<1x128xf32, #tpu.memory_space<vmem>>
    %36 = tpu.memref_slice %arg11[%c4_i32_12] : memref<8x!tpu.dma_semaphore, #tpu.memory_space<semaphore_mem>> -> memref<1x!tpu.dma_semaphore, #tpu.memory_space<semaphore_mem>>
    %37 = tpu.memref_squeeze %36 : memref<1x!tpu.dma_semaphore, #tpu.memory_space<semaphore_mem>> -> memref<!tpu.dma_semaphore, #tpu.memory_space<semaphore_mem>>
    tpu.enqueue_dma source(%34 : memref<1x128xf32, #tpu.memory_space<any>>) target(%35 : memref<1x128xf32, #tpu.memory_space<vmem>>) target_semaphore(%37 : memref<!tpu.dma_semaphore, #tpu.memory_space<semaphore_mem>>)
    %c5_i32 = arith.constant 5 : i32
    %38 = arith.addi %0, %c5_i32 : i32
    %39 = arith.index_cast %38 : i32 to index
    %40 = memref.load %arg2[%39] : memref<8xi32, #tpu.memory_space<smem>>
    %c5_i32_15 = arith.constant 5 : i32
    %41 = tpu.memref_slice %arg5[%40, %2] : memref<16x128xf32, #tpu.memory_space<any>> -> memref<1x128xf32, #tpu.memory_space<any>>
    %c5_i32_16 = arith.constant 5 : i32
    %c0_i32_17 = arith.constant 0 : i32
    %42 = tpu.memref_slice %arg9[%c5_i32_16, %c0_i32_17] : memref<8x128xf32, #tpu.memory_space<vmem>> -> memref<1x128xf32, #tpu.memory_space<vmem>>
    %43 = tpu.memref_slice %arg11[%c5_i32_15] : memref<8x!tpu.dma_semaphore, #tpu.memory_space<semaphore_mem>> -> memref<1x!tpu.dma_semaphore, #tpu.memory_space<semaphore_mem>>
    %44 = tpu.memref_squeeze %43 : memref<1x!tpu.dma_semaphore, #tpu.memory_space<semaphore_mem>> -> memref<!tpu.dma_semaphore, #tpu.memory_space<semaphore_mem>>
    tpu.enqueue_dma source(%41 : memref<1x128xf32, #tpu.memory_space<any>>) target(%42 : memref<1x128xf32, #tpu.memory_space<vmem>>) target_semaphore(%44 : memref<!tpu.dma_semaphore, #tpu.memory_space<semaphore_mem>>)
    %c6_i32 = arith.constant 6 : i32
    %45 = arith.addi %0, %c6_i32 : i32
    %46 = arith.index_cast %45 : i32 to index
    %47 = memref.load %arg2[%46] : memref<8xi32, #tpu.memory_space<smem>>
    %c6_i32_18 = arith.constant 6 : i32
    %48 = tpu.memref_slice %arg5[%47, %2] : memref<16x128xf32, #tpu.memory_space<any>> -> memref<1x128xf32, #tpu.memory_space<any>>
    %c6_i32_19 = arith.constant 6 : i32
    %c0_i32_20 = arith.constant 0 : i32
    %49 = tpu.memref_slice %arg9[%c6_i32_19, %c0_i32_20] : memref<8x128xf32, #tpu.memory_space<vmem>> -> memref<1x128xf32, #tpu.memory_space<vmem>>
    %50 = tpu.memref_slice %arg11[%c6_i32_18] : memref<8x!tpu.dma_semaphore, #tpu.memory_space<semaphore_mem>> -> memref<1x!tpu.dma_semaphore, #tpu.memory_space<semaphore_mem>>
    %51 = tpu.memref_squeeze %50 : memref<1x!tpu.dma_semaphore, #tpu.memory_space<semaphore_mem>> -> memref<!tpu.dma_semaphore, #tpu.memory_space<semaphore_mem>>
    tpu.enqueue_dma source(%48 : memref<1x128xf32, #tpu.memory_space<any>>) target(%49 : memref<1x128xf32, #tpu.memory_space<vmem>>) target_semaphore(%51 : memref<!tpu.dma_semaphore, #tpu.memory_space<semaphore_mem>>)
    %c7_i32 = arith.constant 7 : i32
    %52 = arith.addi %0, %c7_i32 : i32
    %53 = arith.index_cast %52 : i32 to index
    %54 = memref.load %arg2[%53] : memref<8xi32, #tpu.memory_space<smem>>
    %c7_i32_21 = arith.constant 7 : i32
    %55 = tpu.memref_slice %arg5[%54, %2] : memref<16x128xf32, #tpu.memory_space<any>> -> memref<1x128xf32, #tpu.memory_space<any>>
    %c7_i32_22 = arith.constant 7 : i32
    %c0_i32_23 = arith.constant 0 : i32
    %56 = tpu.memref_slice %arg9[%c7_i32_22, %c0_i32_23] : memref<8x128xf32, #tpu.memory_space<vmem>> -> memref<1x128xf32, #tpu.memory_space<vmem>>
    %57 = tpu.memref_slice %arg11[%c7_i32_21] : memref<8x!tpu.dma_semaphore, #tpu.memory_space<semaphore_mem>> -> memref<1x!tpu.dma_semaphore, #tpu.memory_space<semaphore_mem>>
    %58 = tpu.memref_squeeze %57 : memref<1x!tpu.dma_semaphore, #tpu.memory_space<semaphore_mem>> -> memref<!tpu.dma_semaphore, #tpu.memory_space<semaphore_mem>>
    tpu.enqueue_dma source(%55 : memref<1x128xf32, #tpu.memory_space<any>>) target(%56 : memref<1x128xf32, #tpu.memory_space<vmem>>) target_semaphore(%58 : memref<!tpu.dma_semaphore, #tpu.memory_space<semaphore_mem>>)
    %c0_i32_24 = arith.constant 0 : i32
    %59 = arith.cmpi eq, %arg1, %c0_i32_24 : i32
    %60 = arith.extui %59 : i1 to i32
    %c0_i32_25 = arith.constant 0 : i32
    %61 = arith.cmpi ne, %60, %c0_i32_25 : i32
    scf.if %61 {
      %c0_i32_75 = arith.constant 0 : i32
      %112 = arith.addi %0, %c0_i32_75 : i32
      %113 = arith.index_cast %112 : i32 to index
      %114 = memref.load %arg2[%113] : memref<8xi32, #tpu.memory_space<smem>>
      %c0_i32_76 = arith.constant 0 : i32
      %c0_i32_77 = arith.constant 0 : i32
      %115 = tpu.memref_slice %arg4[%114, %c0_i32_77] : memref<16x128xf32, #tpu.memory_space<any>> -> memref<1x128xf32, #tpu.memory_space<any>>
      %c0_i32_78 = arith.constant 0 : i32
      %c0_i32_79 = arith.constant 0 : i32
      %116 = tpu.memref_slice %arg8[%c0_i32_78, %c0_i32_79] : memref<8x128xf32, #tpu.memory_space<vmem>> -> memref<1x128xf32, #tpu.memory_space<vmem>>
      %117 = tpu.memref_slice %arg10[%c0_i32_76] : memref<8x!tpu.dma_semaphore, #tpu.memory_space<semaphore_mem>> -> memref<1x!tpu.dma_semaphore, #tpu.memory_space<semaphore_mem>>
      %118 = tpu.memref_squeeze %117 : memref<1x!tpu.dma_semaphore, #tpu.memory_space<semaphore_mem>> -> memref<!tpu.dma_semaphore, #tpu.memory_space<semaphore_mem>>
      tpu.enqueue_dma source(%115 : memref<1x128xf32, #tpu.memory_space<any>>) target(%116 : memref<1x128xf32, #tpu.memory_space<vmem>>) target_semaphore(%118 : memref<!tpu.dma_semaphore, #tpu.memory_space<semaphore_mem>>)
      %c1_i32_80 = arith.constant 1 : i32
      %119 = arith.addi %0, %c1_i32_80 : i32
      %120 = arith.index_cast %119 : i32 to index
      %121 = memref.load %arg2[%120] : memref<8xi32, #tpu.memory_space<smem>>
      %c1_i32_81 = arith.constant 1 : i32
      %c0_i32_82 = arith.constant 0 : i32
      %122 = tpu.memref_slice %arg4[%121, %c0_i32_82] : memref<16x128xf32, #tpu.memory_space<any>> -> memref<1x128xf32, #tpu.memory_space<any>>
      %c1_i32_83 = arith.constant 1 : i32
      %c0_i32_84 = arith.constant 0 : i32
      %123 = tpu.memref_slice %arg8[%c1_i32_83, %c0_i32_84] : memref<8x128xf32, #tpu.memory_space<vmem>> -> memref<1x128xf32, #tpu.memory_space<vmem>>
      %124 = tpu.memref_slice %arg10[%c1_i32_81] : memref<8x!tpu.dma_semaphore, #tpu.memory_space<semaphore_mem>> -> memref<1x!tpu.dma_semaphore, #tpu.memory_space<semaphore_mem>>
      %125 = tpu.memref_squeeze %124 : memref<1x!tpu.dma_semaphore, #tpu.memory_space<semaphore_mem>> -> memref<!tpu.dma_semaphore, #tpu.memory_space<semaphore_mem>>
      tpu.enqueue_dma source(%122 : memref<1x128xf32, #tpu.memory_space<any>>) target(%123 : memref<1x128xf32, #tpu.memory_space<vmem>>) target_semaphore(%125 : memref<!tpu.dma_semaphore, #tpu.memory_space<semaphore_mem>>)
      %c2_i32_85 = arith.constant 2 : i32
      %126 = arith.addi %0, %c2_i32_85 : i32
      %127 = arith.index_cast %126 : i32 to index
      %128 = memref.load %arg2[%127] : memref<8xi32, #tpu.memory_space<smem>>
      %c2_i32_86 = arith.constant 2 : i32
      %c0_i32_87 = arith.constant 0 : i32
      %129 = tpu.memref_slice %arg4[%128, %c0_i32_87] : memref<16x128xf32, #tpu.memory_space<any>> -> memref<1x128xf32, #tpu.memory_space<any>>
      %c2_i32_88 = arith.constant 2 : i32
      %c0_i32_89 = arith.constant 0 : i32
      %130 = tpu.memref_slice %arg8[%c2_i32_88, %c0_i32_89] : memref<8x128xf32, #tpu.memory_space<vmem>> -> memref<1x128xf32, #tpu.memory_space<vmem>>
      %131 = tpu.memref_slice %arg10[%c2_i32_86] : memref<8x!tpu.dma_semaphore, #tpu.memory_space<semaphore_mem>> -> memref<1x!tpu.dma_semaphore, #tpu.memory_space<semaphore_mem>>
      %132 = tpu.memref_squeeze %131 : memref<1x!tpu.dma_semaphore, #tpu.memory_space<semaphore_mem>> -> memref<!tpu.dma_semaphore, #tpu.memory_space<semaphore_mem>>
      tpu.enqueue_dma source(%129 : memref<1x128xf32, #tpu.memory_space<any>>) target(%130 : memref<1x128xf32, #tpu.memory_space<vmem>>) target_semaphore(%132 : memref<!tpu.dma_semaphore, #tpu.memory_space<semaphore_mem>>)
      %c3_i32_90 = arith.constant 3 : i32
      %133 = arith.addi %0, %c3_i32_90 : i32
      %134 = arith.index_cast %133 : i32 to index
      %135 = memref.load %arg2[%134] : memref<8xi32, #tpu.memory_space<smem>>
      %c3_i32_91 = arith.constant 3 : i32
      %c0_i32_92 = arith.constant 0 : i32
      %136 = tpu.memref_slice %arg4[%135, %c0_i32_92] : memref<16x128xf32, #tpu.memory_space<any>> -> memref<1x128xf32, #tpu.memory_space<any>>
      %c3_i32_93 = arith.constant 3 : i32
      %c0_i32_94 = arith.constant 0 : i32
      %137 = tpu.memref_slice %arg8[%c3_i32_93, %c0_i32_94] : memref<8x128xf32, #tpu.memory_space<vmem>> -> memref<1x128xf32, #tpu.memory_space<vmem>>
      %138 = tpu.memref_slice %arg10[%c3_i32_91] : memref<8x!tpu.dma_semaphore, #tpu.memory_space<semaphore_mem>> -> memref<1x!tpu.dma_semaphore, #tpu.memory_space<semaphore_mem>>
      %139 = tpu.memref_squeeze %138 : memref<1x!tpu.dma_semaphore, #tpu.memory_space<semaphore_mem>> -> memref<!tpu.dma_semaphore, #tpu.memory_space<semaphore_mem>>
      tpu.enqueue_dma source(%136 : memref<1x128xf32, #tpu.memory_space<any>>) target(%137 : memref<1x128xf32, #tpu.memory_space<vmem>>) target_semaphore(%139 : memref<!tpu.dma_semaphore, #tpu.memory_space<semaphore_mem>>)
      %c4_i32_95 = arith.constant 4 : i32
      %140 = arith.addi %0, %c4_i32_95 : i32
      %141 = arith.index_cast %140 : i32 to index
      %142 = memref.load %arg2[%141] : memref<8xi32, #tpu.memory_space<smem>>
      %c4_i32_96 = arith.constant 4 : i32
      %c0_i32_97 = arith.constant 0 : i32
      %143 = tpu.memref_slice %arg4[%142, %c0_i32_97] : memref<16x128xf32, #tpu.memory_space<any>> -> memref<1x128xf32, #tpu.memory_space<any>>
      %c4_i32_98 = arith.constant 4 : i32
      %c0_i32_99 = arith.constant 0 : i32
      %144 = tpu.memref_slice %arg8[%c4_i32_98, %c0_i32_99] : memref<8x128xf32, #tpu.memory_space<vmem>> -> memref<1x128xf32, #tpu.memory_space<vmem>>
      %145 = tpu.memref_slice %arg10[%c4_i32_96] : memref<8x!tpu.dma_semaphore, #tpu.memory_space<semaphore_mem>> -> memref<1x!tpu.dma_semaphore, #tpu.memory_space<semaphore_mem>>
      %146 = tpu.memref_squeeze %145 : memref<1x!tpu.dma_semaphore, #tpu.memory_space<semaphore_mem>> -> memref<!tpu.dma_semaphore, #tpu.memory_space<semaphore_mem>>
      tpu.enqueue_dma source(%143 : memref<1x128xf32, #tpu.memory_space<any>>) target(%144 : memref<1x128xf32, #tpu.memory_space<vmem>>) target_semaphore(%146 : memref<!tpu.dma_semaphore, #tpu.memory_space<semaphore_mem>>)
      %c5_i32_100 = arith.constant 5 : i32
      %147 = arith.addi %0, %c5_i32_100 : i32
      %148 = arith.index_cast %147 : i32 to index
      %149 = memref.load %arg2[%148] : memref<8xi32, #tpu.memory_space<smem>>
      %c5_i32_101 = arith.constant 5 : i32
      %c0_i32_102 = arith.constant 0 : i32
      %150 = tpu.memref_slice %arg4[%149, %c0_i32_102] : memref<16x128xf32, #tpu.memory_space<any>> -> memref<1x128xf32, #tpu.memory_space<any>>
      %c5_i32_103 = arith.constant 5 : i32
      %c0_i32_104 = arith.constant 0 : i32
      %151 = tpu.memref_slice %arg8[%c5_i32_103, %c0_i32_104] : memref<8x128xf32, #tpu.memory_space<vmem>> -> memref<1x128xf32, #tpu.memory_space<vmem>>
      %152 = tpu.memref_slice %arg10[%c5_i32_101] : memref<8x!tpu.dma_semaphore, #tpu.memory_space<semaphore_mem>> -> memref<1x!tpu.dma_semaphore, #tpu.memory_space<semaphore_mem>>
      %153 = tpu.memref_squeeze %152 : memref<1x!tpu.dma_semaphore, #tpu.memory_space<semaphore_mem>> -> memref<!tpu.dma_semaphore, #tpu.memory_space<semaphore_mem>>
      tpu.enqueue_dma source(%150 : memref<1x128xf32, #tpu.memory_space<any>>) target(%151 : memref<1x128xf32, #tpu.memory_space<vmem>>) target_semaphore(%153 : memref<!tpu.dma_semaphore, #tpu.memory_space<semaphore_mem>>)
      %c6_i32_105 = arith.constant 6 : i32
      %154 = arith.addi %0, %c6_i32_105 : i32
      %155 = arith.index_cast %154 : i32 to index
      %156 = memref.load %arg2[%155] : memref<8xi32, #tpu.memory_space<smem>>
      %c6_i32_106 = arith.constant 6 : i32
      %c0_i32_107 = arith.constant 0 : i32
      %157 = tpu.memref_slice %arg4[%156, %c0_i32_107] : memref<16x128xf32, #tpu.memory_space<any>> -> memref<1x128xf32, #tpu.memory_space<any>>
      %c6_i32_108 = arith.constant 6 : i32
      %c0_i32_109 = arith.constant 0 : i32
      %158 = tpu.memref_slice %arg8[%c6_i32_108, %c0_i32_109] : memref<8x128xf32, #tpu.memory_space<vmem>> -> memref<1x128xf32, #tpu.memory_space<vmem>>
      %159 = tpu.memref_slice %arg10[%c6_i32_106] : memref<8x!tpu.dma_semaphore, #tpu.memory_space<semaphore_mem>> -> memref<1x!tpu.dma_semaphore, #tpu.memory_space<semaphore_mem>>
      %160 = tpu.memref_squeeze %159 : memref<1x!tpu.dma_semaphore, #tpu.memory_space<semaphore_mem>> -> memref<!tpu.dma_semaphore, #tpu.memory_space<semaphore_mem>>
      tpu.enqueue_dma source(%157 : memref<1x128xf32, #tpu.memory_space<any>>) target(%158 : memref<1x128xf32, #tpu.memory_space<vmem>>) target_semaphore(%160 : memref<!tpu.dma_semaphore, #tpu.memory_space<semaphore_mem>>)
      %c7_i32_110 = arith.constant 7 : i32
      %161 = arith.addi %0, %c7_i32_110 : i32
      %162 = arith.index_cast %161 : i32 to index
      %163 = memref.load %arg2[%162] : memref<8xi32, #tpu.memory_space<smem>>
      %c7_i32_111 = arith.constant 7 : i32
      %c0_i32_112 = arith.constant 0 : i32
      %164 = tpu.memref_slice %arg4[%163, %c0_i32_112] : memref<16x128xf32, #tpu.memory_space<any>> -> memref<1x128xf32, #tpu.memory_space<any>>
      %c7_i32_113 = arith.constant 7 : i32
      %c0_i32_114 = arith.constant 0 : i32
      %165 = tpu.memref_slice %arg8[%c7_i32_113, %c0_i32_114] : memref<8x128xf32, #tpu.memory_space<vmem>> -> memref<1x128xf32, #tpu.memory_space<vmem>>
      %166 = tpu.memref_slice %arg10[%c7_i32_111] : memref<8x!tpu.dma_semaphore, #tpu.memory_space<semaphore_mem>> -> memref<1x!tpu.dma_semaphore, #tpu.memory_space<semaphore_mem>>
      %167 = tpu.memref_squeeze %166 : memref<1x!tpu.dma_semaphore, #tpu.memory_space<semaphore_mem>> -> memref<!tpu.dma_semaphore, #tpu.memory_space<semaphore_mem>>
      tpu.enqueue_dma source(%164 : memref<1x128xf32, #tpu.memory_space<any>>) target(%165 : memref<1x128xf32, #tpu.memory_space<vmem>>) target_semaphore(%167 : memref<!tpu.dma_semaphore, #tpu.memory_space<semaphore_mem>>)
      %cst_115 = arith.constant 0.000000e+00 : f32
      %168 = vector.broadcast %cst_115 : f32 to vector<8x128xf32>
      %c0_116 = arith.constant 0 : index
      %c0_117 = arith.constant 0 : index
      %169 = vector.load %arg7[%c0_116, %c0_117] : memref<8x128xf32, #tpu.memory_space<vmem>>, vector<8x128xf32>
      tpu.vector_store %arg7[%c0_116, %c0_117], %168 {strides = array<i32>} : memref<8x128xf32, #tpu.memory_space<vmem>>, vector<8x128xf32>,
    } else {
    }
    %62 = tpu.iota {dimensions = array<i32: 0>} : vector<128x128xi32>
    %63 = vector.broadcast %2 : i32 to vector<128x128xi32>
    %64 = arith.addi %62, %63 : vector<128x128xi32>
    %c0 = arith.constant 0 : index
    %c0_26 = arith.constant 0 : index
    %65 = vector.load %arg3[%c0, %c0_26] : memref<1x128xi32, #tpu.memory_space<vmem>>, vector<1x128xi32>
    %66 = vector.broadcast %65 : vector<1x128xi32> to vector<128x128xi32>
    %67 = arith.cmpi eq, %64, %66 : vector<128x128xi32>
    %68 = arith.extui %67 : vector<128x128xi1> to vector<128x128xi32>
    %69 = arith.sitofp %68 : vector<128x128xi32> to vector<128x128xf32>
    %70 = arith.truncf %69 : vector<128x128xf32> to vector<128x128xbf16>
    %c0_i32_27 = arith.constant 0 : i32
    %c0_i32_28 = arith.constant 0 : i32
    %c0_i32_29 = arith.constant 0 : i32
    %71 = tpu.memref_slice %arg5[%c0_i32_28, %c0_i32_29] : memref<16x128xf32, #tpu.memory_space<any>> -> memref<1x128xf32, #tpu.memory_space<any>>
    %c0_i32_30 = arith.constant 0 : i32
    %c0_i32_31 = arith.constant 0 : i32
    %72 = tpu.memref_slice %arg9[%c0_i32_30, %c0_i32_31] : memref<8x128xf32, #tpu.memory_space<vmem>> -> memref<1x128xf32, #tpu.memory_space<vmem>>
    %73 = tpu.memref_slice %arg11[%c0_i32_27] : memref<8x!tpu.dma_semaphore, #tpu.memory_space<semaphore_mem>> -> memref<1x!tpu.dma_semaphore, #tpu.memory_space<semaphore_mem>>
    %74 = tpu.memref_squeeze %73 : memref<1x!tpu.dma_semaphore, #tpu.memory_space<semaphore_mem>> -> memref<!tpu.dma_semaphore, #tpu.memory_space<semaphore_mem>>
    tpu.wait_dma2 semaphore(%74 : memref<!tpu.dma_semaphore, #tpu.memory_space<semaphore_mem>>) src(%71 : memref<1x128xf32, #tpu.memory_space<any>>) dst(%72 : memref<1x128xf32, #tpu.memory_space<vmem>>)
    %c1_i32_32 = arith.constant 1 : i32
    %c0_i32_33 = arith.constant 0 : i32
    %c0_i32_34 = arith.constant 0 : i32
    %75 = tpu.memref_slice %arg5[%c0_i32_33, %c0_i32_34] : memref<16x128xf32, #tpu.memory_space<any>> -> memref<1x128xf32, #tpu.memory_space<any>>
    %c1_i32_35 = arith.constant 1 : i32
    %c0_i32_36 = arith.constant 0 : i32
    %76 = tpu.memref_slice %arg9[%c1_i32_35, %c0_i32_36] : memref<8x128xf32, #tpu.memory_space<vmem>> -> memref<1x128xf32, #tpu.memory_space<vmem>>
    %77 = tpu.memref_slice %arg11[%c1_i32_32] : memref<8x!tpu.dma_semaphore, #tpu.memory_space<semaphore_mem>> -> memref<1x!tpu.dma_semaphore, #tpu.memory_space<semaphore_mem>>
    %78 = tpu.memref_squeeze %77 : memref<1x!tpu.dma_semaphore, #tpu.memory_space<semaphore_mem>> -> memref<!tpu.dma_semaphore, #tpu.memory_space<semaphore_mem>>
    tpu.wait_dma2 semaphore(%78 : memref<!tpu.dma_semaphore, #tpu.memory_space<semaphore_mem>>) src(%75 : memref<1x128xf32, #tpu.memory_space<any>>) dst(%76 : memref<1x128xf32, #tpu.memory_space<vmem>>)
    %c2_i32_37 = arith.constant 2 : i32
    %c0_i32_38 = arith.constant 0 : i32
    %c0_i32_39 = arith.constant 0 : i32
    %79 = tpu.memref_slice %arg5[%c0_i32_38, %c0_i32_39] : memref<16x128xf32, #tpu.memory_space<any>> -> memref<1x128xf32, #tpu.memory_space<any>>
    %c2_i32_40 = arith.constant 2 : i32
    %c0_i32_41 = arith.constant 0 : i32
    %80 = tpu.memref_slice %arg9[%c2_i32_40, %c0_i32_41] : memref<8x128xf32, #tpu.memory_space<vmem>> -> memref<1x128xf32, #tpu.memory_space<vmem>>
    %81 = tpu.memref_slice %arg11[%c2_i32_37] : memref<8x!tpu.dma_semaphore, #tpu.memory_space<semaphore_mem>> -> memref<1x!tpu.dma_semaphore, #tpu.memory_space<semaphore_mem>>
    %82 = tpu.memref_squeeze %81 : memref<1x!tpu.dma_semaphore, #tpu.memory_space<semaphore_mem>> -> memref<!tpu.dma_semaphore, #tpu.memory_space<semaphore_mem>>
    tpu.wait_dma2 semaphore(%82 : memref<!tpu.dma_semaphore, #tpu.memory_space<semaphore_mem>>) src(%79 : memref<1x128xf32, #tpu.memory_space<any>>) dst(%80 : memref<1x128xf32, #tpu.memory_space<vmem>>)
    %c3_i32_42 = arith.constant 3 : i32
    %c0_i32_43 = arith.constant 0 : i32
    %c0_i32_44 = arith.constant 0 : i32
    %83 = tpu.memref_slice %arg5[%c0_i32_43, %c0_i32_44] : memref<16x128xf32, #tpu.memory_space<any>> -> memref<1x128xf32, #tpu.memory_space<any>>
    %c3_i32_45 = arith.constant 3 : i32
    %c0_i32_46 = arith.constant 0 : i32
    %84 = tpu.memref_slice %arg9[%c3_i32_45, %c0_i32_46] : memref<8x128xf32, #tpu.memory_space<vmem>> -> memref<1x128xf32, #tpu.memory_space<vmem>>
    %85 = tpu.memref_slice %arg11[%c3_i32_42] : memref<8x!tpu.dma_semaphore, #tpu.memory_space<semaphore_mem>> -> memref<1x!tpu.dma_semaphore, #tpu.memory_space<semaphore_mem>>
    %86 = tpu.memref_squeeze %85 : memref<1x!tpu.dma_semaphore, #tpu.memory_space<semaphore_mem>> -> memref<!tpu.dma_semaphore, #tpu.memory_space<semaphore_mem>>
    tpu.wait_dma2 semaphore(%86 : memref<!tpu.dma_semaphore, #tpu.memory_space<semaphore_mem>>) src(%83 : memref<1x128xf32, #tpu.memory_space<any>>) dst(%84 : memref<1x128xf32, #tpu.memory_space<vmem>>)
    %c4_i32_47 = arith.constant 4 : i32
    %c0_i32_48 = arith.constant 0 : i32
    %c0_i32_49 = arith.constant 0 : i32
    %87 = tpu.memref_slice %arg5[%c0_i32_48, %c0_i32_49] : memref<16x128xf32, #tpu.memory_space<any>> -> memref<1x128xf32, #tpu.memory_space<any>>
    %c4_i32_50 = arith.constant 4 : i32
    %c0_i32_51 = arith.constant 0 : i32
    %88 = tpu.memref_slice %arg9[%c4_i32_50, %c0_i32_51] : memref<8x128xf32, #tpu.memory_space<vmem>> -> memref<1x128xf32, #tpu.memory_space<vmem>>
    %89 = tpu.memref_slice %arg11[%c4_i32_47] : memref<8x!tpu.dma_semaphore, #tpu.memory_space<semaphore_mem>> -> memref<1x!tpu.dma_semaphore, #tpu.memory_space<semaphore_mem>>
    %90 = tpu.memref_squeeze %89 : memref<1x!tpu.dma_semaphore, #tpu.memory_space<semaphore_mem>> -> memref<!tpu.dma_semaphore, #tpu.memory_space<semaphore_mem>>
    tpu.wait_dma2 semaphore(%90 : memref<!tpu.dma_semaphore, #tpu.memory_space<semaphore_mem>>) src(%87 : memref<1x128xf32, #tpu.memory_space<any>>) dst(%88 : memref<1x128xf32, #tpu.memory_space<vmem>>)
    %c5_i32_52 = arith.constant 5 : i32
    %c0_i32_53 = arith.constant 0 : i32
    %c0_i32_54 = arith.constant 0 : i32
    %91 = tpu.memref_slice %arg5[%c0_i32_53, %c0_i32_54] : memref<16x128xf32, #tpu.memory_space<any>> -> memref<1x128xf32, #tpu.memory_space<any>>
    %c5_i32_55 = arith.constant 5 : i32
    %c0_i32_56 = arith.constant 0 : i32
    %92 = tpu.memref_slice %arg9[%c5_i32_55, %c0_i32_56] : memref<8x128xf32, #tpu.memory_space<vmem>> -> memref<1x128xf32, #tpu.memory_space<vmem>>
    %93 = tpu.memref_slice %arg11[%c5_i32_52] : memref<8x!tpu.dma_semaphore, #tpu.memory_space<semaphore_mem>> -> memref<1x!tpu.dma_semaphore, #tpu.memory_space<semaphore_mem>>
    %94 = tpu.memref_squeeze %93 : memref<1x!tpu.dma_semaphore, #tpu.memory_space<semaphore_mem>> -> memref<!tpu.dma_semaphore, #tpu.memory_space<semaphore_mem>>
    tpu.wait_dma2 semaphore(%94 : memref<!tpu.dma_semaphore, #tpu.memory_space<semaphore_mem>>) src(%91 : memref<1x128xf32, #tpu.memory_space<any>>) dst(%92 : memref<1x128xf32, #tpu.memory_space<vmem>>)
    %c6_i32_57 = arith.constant 6 : i32
    %c0_i32_58 = arith.constant 0 : i32
    %c0_i32_59 = arith.constant 0 : i32
    %95 = tpu.memref_slice %arg5[%c0_i32_58, %c0_i32_59] : memref<16x128xf32, #tpu.memory_space<any>> -> memref<1x128xf32, #tpu.memory_space<any>>
    %c6_i32_60 = arith.constant 6 : i32
    %c0_i32_61 = arith.constant 0 : i32
    %96 = tpu.memref_slice %arg9[%c6_i32_60, %c0_i32_61] : memref<8x128xf32, #tpu.memory_space<vmem>> -> memref<1x128xf32, #tpu.memory_space<vmem>>
    %97 = tpu.memref_slice %arg11[%c6_i32_57] : memref<8x!tpu.dma_semaphore, #tpu.memory_space<semaphore_mem>> -> memref<1x!tpu.dma_semaphore, #tpu.memory_space<semaphore_mem>>
    %98 = tpu.memref_squeeze %97 : memref<1x!tpu.dma_semaphore, #tpu.memory_space<semaphore_mem>> -> memref<!tpu.dma_semaphore, #tpu.memory_space<semaphore_mem>>
    tpu.wait_dma2 semaphore(%98 : memref<!tpu.dma_semaphore, #tpu.memory_space<semaphore_mem>>) src(%95 : memref<1x128xf32, #tpu.memory_space<any>>) dst(%96 : memref<1x128xf32, #tpu.memory_space<vmem>>)
    %c7_i32_62 = arith.constant 7 : i32
    %c0_i32_63 = arith.constant 0 : i32
    %c0_i32_64 = arith.constant 0 : i32
    %99 = tpu.memref_slice %arg5[%c0_i32_63, %c0_i32_64] : memref<16x128xf32, #tpu.memory_space<any>> -> memref<1x128xf32, #tpu.memory_space<any>>
    %c7_i32_65 = arith.constant 7 : i32
    %c0_i32_66 = arith.constant 0 : i32
    %100 = tpu.memref_slice %arg9[%c7_i32_65, %c0_i32_66] : memref<8x128xf32, #tpu.memory_space<vmem>> -> memref<1x128xf32, #tpu.memory_space<vmem>>
    %101 = tpu.memref_slice %arg11[%c7_i32_62] : memref<8x!tpu.dma_semaphore, #tpu.memory_space<semaphore_mem>> -> memref<1x!tpu.dma_semaphore, #tpu.memory_space<semaphore_mem>>
    %102 = tpu.memref_squeeze %101 : memref<1x!tpu.dma_semaphore, #tpu.memory_space<semaphore_mem>> -> memref<!tpu.dma_semaphore, #tpu.memory_space<semaphore_mem>>
    tpu.wait_dma2 semaphore(%102 : memref<!tpu.dma_semaphore, #tpu.memory_space<semaphore_mem>>) src(%99 : memref<1x128xf32, #tpu.memory_space<any>>) dst(%100 : memref<1x128xf32, #tpu.memory_space<vmem>>)
    %c0_67 = arith.constant 0 : index
    %c0_68 = arith.constant 0 : index
    %103 = vector.load %arg7[%c0_67, %c0_68] : memref<8x128xf32, #tpu.memory_space<vmem>>, vector<8x128xf32>
    %c0_69 = arith.constant 0 : index
    %c0_70 = arith.constant 0 : index
    %104 = vector.load %arg9[%c0_69, %c0_70] : memref<8x128xf32, #tpu.memory_space<vmem>>, vector<8x128xf32>
    %105 = arith.truncf %104 : vector<8x128xf32> to vector<8x128xbf16>
    %cst = arith.constant dense<0.000000e+00> : vector<8x128xf32>
    %106 = tpu.matmul %105, %70, %cst {dimension_numbers = #tpu.dot_dimension_numbers<[1], [0], [0], [1], [0, 0, 1, 1], [], []>} : vector<8x128xbf16>, vector<128x128xbf16>, vector<8x128xf32> -> vector<8x128xf32>
    %107 = arith.addf %103, %106 : vector<8x128xf32>
    %c0_71 = arith.constant 0 : index
    %c0_72 = arith.constant 0 : index
    %108 = vector.load %arg7[%c0_71, %c0_72] : memref<8x128xf32, #tpu.memory_space<vmem>>, vector<8x128xf32>
    tpu.vector_store %arg7[%c0_71, %c0_72], %107 {strides = array<i32>} : memref<8x128xf32, #tpu.memory_space<vmem>>, vector<8x128xf32>,
    %c0_i32_73 = arith.constant 0 : i32
    %109 = arith.cmpi eq, %arg1, %c0_i32_73 : i32
    %110 = arith.extui %109 : i1 to i32
    %c0_i32_74 = arith.constant 0 : i32
    %111 = arith.cmpi ne, %110, %c0_i32_74 : i32
    scf.if %111 {
      %c0_i32_75 = arith.constant 0 : i32
      %c0_i32_76 = arith.constant 0 : i32
      %c0_i32_77 = arith.constant 0 : i32
      %112 = tpu.memref_slice %arg4[%c0_i32_76, %c0_i32_77] : memref<16x128xf32, #tpu.memory_space<any>> -> memref<1x128xf32, #tpu.memory_space<any>>
      %c0_i32_78 = arith.constant 0 : i32
      %c0_i32_79 = arith.constant 0 : i32
      %113 = tpu.memref_slice %arg8[%c0_i32_78, %c0_i32_79] : memref<8x128xf32, #tpu.memory_space<vmem>> -> memref<1x128xf32, #tpu.memory_space<vmem>>
      %114 = tpu.memref_slice %arg10[%c0_i32_75] : memref<8x!tpu.dma_semaphore, #tpu.memory_space<semaphore_mem>> -> memref<1x!tpu.dma_semaphore, #tpu.memory_space<semaphore_mem>>
      %115 = tpu.memref_squeeze %114 : memref<1x!tpu.dma_semaphore, #tpu.memory_space<semaphore_mem>> -> memref<!tpu.dma_semaphore, #tpu.memory_space<semaphore_mem>>
      tpu.wait_dma2 semaphore(%115 : memref<!tpu.dma_semaphore, #tpu.memory_space<semaphore_mem>>) src(%112 : memref<1x128xf32, #tpu.memory_space<any>>) dst(%113 : memref<1x128xf32, #tpu.memory_space<vmem>>)
      %c1_i32_80 = arith.constant 1 : i32
      %c0_i32_81 = arith.constant 0 : i32
      %c0_i32_82 = arith.constant 0 : i32
      %116 = tpu.memref_slice %arg4[%c0_i32_81, %c0_i32_82] : memref<16x128xf32, #tpu.memory_space<any>> -> memref<1x128xf32, #tpu.memory_space<any>>
      %c1_i32_83 = arith.constant 1 : i32
      %c0_i32_84 = arith.constant 0 : i32
      %117 = tpu.memref_slice %arg8[%c1_i32_83, %c0_i32_84] : memref<8x128xf32, #tpu.memory_space<vmem>> -> memref<1x128xf32, #tpu.memory_space<vmem>>
      %118 = tpu.memref_slice %arg10[%c1_i32_80] : memref<8x!tpu.dma_semaphore, #tpu.memory_space<semaphore_mem>> -> memref<1x!tpu.dma_semaphore, #tpu.memory_space<semaphore_mem>>
      %119 = tpu.memref_squeeze %118 : memref<1x!tpu.dma_semaphore, #tpu.memory_space<semaphore_mem>> -> memref<!tpu.dma_semaphore, #tpu.memory_space<semaphore_mem>>
      tpu.wait_dma2 semaphore(%119 : memref<!tpu.dma_semaphore, #tpu.memory_space<semaphore_mem>>) src(%116 : memref<1x128xf32, #tpu.memory_space<any>>) dst(%117 : memref<1x128xf32, #tpu.memory_space<vmem>>)
      %c2_i32_85 = arith.constant 2 : i32
      %c0_i32_86 = arith.constant 0 : i32
      %c0_i32_87 = arith.constant 0 : i32
      %120 = tpu.memref_slice %arg4[%c0_i32_86, %c0_i32_87] : memref<16x128xf32, #tpu.memory_space<any>> -> memref<1x128xf32, #tpu.memory_space<any>>
      %c2_i32_88 = arith.constant 2 : i32
      %c0_i32_89 = arith.constant 0 : i32
      %121 = tpu.memref_slice %arg8[%c2_i32_88, %c0_i32_89] : memref<8x128xf32, #tpu.memory_space<vmem>> -> memref<1x128xf32, #tpu.memory_space<vmem>>
      %122 = tpu.memref_slice %arg10[%c2_i32_85] : memref<8x!tpu.dma_semaphore, #tpu.memory_space<semaphore_mem>> -> memref<1x!tpu.dma_semaphore, #tpu.memory_space<semaphore_mem>>
      %123 = tpu.memref_squeeze %122 : memref<1x!tpu.dma_semaphore, #tpu.memory_space<semaphore_mem>> -> memref<!tpu.dma_semaphore, #tpu.memory_space<semaphore_mem>>
      tpu.wait_dma2 semaphore(%123 : memref<!tpu.dma_semaphore, #tpu.memory_space<semaphore_mem>>) src(%120 : memref<1x128xf32, #tpu.memory_space<any>>) dst(%121 : memref<1x128xf32, #tpu.memory_space<vmem>>)
      %c3_i32_90 = arith.constant 3 : i32
      %c0_i32_91 = arith.constant 0 : i32
      %c0_i32_92 = arith.constant 0 : i32
      %124 = tpu.memref_slice %arg4[%c0_i32_91, %c0_i32_92] : memref<16x128xf32, #tpu.memory_space<any>> -> memref<1x128xf32, #tpu.memory_space<any>>
      %c3_i32_93 = arith.constant 3 : i32
      %c0_i32_94 = arith.constant 0 : i32
      %125 = tpu.memref_slice %arg8[%c3_i32_93, %c0_i32_94] : memref<8x128xf32, #tpu.memory_space<vmem>> -> memref<1x128xf32, #tpu.memory_space<vmem>>
      %126 = tpu.memref_slice %arg10[%c3_i32_90] : memref<8x!tpu.dma_semaphore, #tpu.memory_space<semaphore_mem>> -> memref<1x!tpu.dma_semaphore, #tpu.memory_space<semaphore_mem>>
      %127 = tpu.memref_squeeze %126 : memref<1x!tpu.dma_semaphore, #tpu.memory_space<semaphore_mem>> -> memref<!tpu.dma_semaphore, #tpu.memory_space<semaphore_mem>>
      tpu.wait_dma2 semaphore(%127 : memref<!tpu.dma_semaphore, #tpu.memory_space<semaphore_mem>>) src(%124 : memref<1x128xf32, #tpu.memory_space<any>>) dst(%125 : memref<1x128xf32, #tpu.memory_space<vmem>>)
      %c4_i32_95 = arith.constant 4 : i32
      %c0_i32_96 = arith.constant 0 : i32
      %c0_i32_97 = arith.constant 0 : i32
      %128 = tpu.memref_slice %arg4[%c0_i32_96, %c0_i32_97] : memref<16x128xf32, #tpu.memory_space<any>> -> memref<1x128xf32, #tpu.memory_space<any>>
      %c4_i32_98 = arith.constant 4 : i32
      %c0_i32_99 = arith.constant 0 : i32
      %129 = tpu.memref_slice %arg8[%c4_i32_98, %c0_i32_99] : memref<8x128xf32, #tpu.memory_space<vmem>> -> memref<1x128xf32, #tpu.memory_space<vmem>>
      %130 = tpu.memref_slice %arg10[%c4_i32_95] : memref<8x!tpu.dma_semaphore, #tpu.memory_space<semaphore_mem>> -> memref<1x!tpu.dma_semaphore, #tpu.memory_space<semaphore_mem>>
      %131 = tpu.memref_squeeze %130 : memref<1x!tpu.dma_semaphore, #tpu.memory_space<semaphore_mem>> -> memref<!tpu.dma_semaphore, #tpu.memory_space<semaphore_mem>>
      tpu.wait_dma2 semaphore(%131 : memref<!tpu.dma_semaphore, #tpu.memory_space<semaphore_mem>>) src(%128 : memref<1x128xf32, #tpu.memory_space<any>>) dst(%129 : memref<1x128xf32, #tpu.memory_space<vmem>>)
      %c5_i32_100 = arith.constant 5 : i32
      %c0_i32_101 = arith.constant 0 : i32
      %c0_i32_102 = arith.constant 0 : i32
      %132 = tpu.memref_slice %arg4[%c0_i32_101, %c0_i32_102] : memref<16x128xf32, #tpu.memory_space<any>> -> memref<1x128xf32, #tpu.memory_space<any>>
      %c5_i32_103 = arith.constant 5 : i32
      %c0_i32_104 = arith.constant 0 : i32
      %133 = tpu.memref_slice %arg8[%c5_i32_103, %c0_i32_104] : memref<8x128xf32, #tpu.memory_space<vmem>> -> memref<1x128xf32, #tpu.memory_space<vmem>>
      %134 = tpu.memref_slice %arg10[%c5_i32_100] : memref<8x!tpu.dma_semaphore, #tpu.memory_space<semaphore_mem>> -> memref<1x!tpu.dma_semaphore, #tpu.memory_space<semaphore_mem>>
      %135 = tpu.memref_squeeze %134 : memref<1x!tpu.dma_semaphore, #tpu.memory_space<semaphore_mem>> -> memref<!tpu.dma_semaphore, #tpu.memory_space<semaphore_mem>>
      tpu.wait_dma2 semaphore(%135 : memref<!tpu.dma_semaphore, #tpu.memory_space<semaphore_mem>>) src(%132 : memref<1x128xf32, #tpu.memory_space<any>>) dst(%133 : memref<1x128xf32, #tpu.memory_space<vmem>>)
      %c6_i32_105 = arith.constant 6 : i32
      %c0_i32_106 = arith.constant 0 : i32
      %c0_i32_107 = arith.constant 0 : i32
      %136 = tpu.memref_slice %arg4[%c0_i32_106, %c0_i32_107] : memref<16x128xf32, #tpu.memory_space<any>> -> memref<1x128xf32, #tpu.memory_space<any>>
      %c6_i32_108 = arith.constant 6 : i32
      %c0_i32_109 = arith.constant 0 : i32
      %137 = tpu.memref_slice %arg8[%c6_i32_108, %c0_i32_109] : memref<8x128xf32, #tpu.memory_space<vmem>> -> memref<1x128xf32, #tpu.memory_space<vmem>>
      %138 = tpu.memref_slice %arg10[%c6_i32_105] : memref<8x!tpu.dma_semaphore, #tpu.memory_space<semaphore_mem>> -> memref<1x!tpu.dma_semaphore, #tpu.memory_space<semaphore_mem>>
      %139 = tpu.memref_squeeze %138 : memref<1x!tpu.dma_semaphore, #tpu.memory_space<semaphore_mem>> -> memref<!tpu.dma_semaphore, #tpu.memory_space<semaphore_mem>>
      tpu.wait_dma2 semaphore(%139 : memref<!tpu.dma_semaphore, #tpu.memory_space<semaphore_mem>>) src(%136 : memref<1x128xf32, #tpu.memory_space<any>>) dst(%137 : memref<1x128xf32, #tpu.memory_space<vmem>>)
      %c7_i32_110 = arith.constant 7 : i32
      %c0_i32_111 = arith.constant 0 : i32
      %c0_i32_112 = arith.constant 0 : i32
      %140 = tpu.memref_slice %arg4[%c0_i32_111, %c0_i32_112] : memref<16x128xf32, #tpu.memory_space<any>> -> memref<1x128xf32, #tpu.memory_space<any>>
      %c7_i32_113 = arith.constant 7 : i32
      %c0_i32_114 = arith.constant 0 : i32
      %141 = tpu.memref_slice %arg8[%c7_i32_113, %c0_i32_114] : memref<8x128xf32, #tpu.memory_space<vmem>> -> memref<1x128xf32, #tpu.memory_space<vmem>>
      %142 = tpu.memref_slice %arg10[%c7_i32_110] : memref<8x!tpu.dma_semaphore, #tpu.memory_space<semaphore_mem>> -> memref<1x!tpu.dma_semaphore, #tpu.memory_space<semaphore_mem>>
      %143 = tpu.memref_squeeze %142 : memref<1x!tpu.dma_semaphore, #tpu.memory_space<semaphore_mem>> -> memref<!tpu.dma_semaphore, #tpu.memory_space<semaphore_mem>>
      tpu.wait_dma2 semaphore(%143 : memref<!tpu.dma_semaphore, #tpu.memory_space<semaphore_mem>>) src(%140 : memref<1x128xf32, #tpu.memory_space<any>>) dst(%141 : memref<1x128xf32, #tpu.memory_space<vmem>>)
      %c0_115 = arith.constant 0 : index
      %c0_116 = arith.constant 0 : index
      %144 = vector.load %arg8[%c0_115, %c0_116] : memref<8x128xf32, #tpu.memory_space<vmem>>, vector<8x128xf32>
      %c0_117 = arith.constant 0 : index
      %c0_118 = arith.constant 0 : index
      %145 = vector.load %arg6[%c0_117, %c0_118] : memref<8x128xf32, #tpu.memory_space<vmem>>, vector<8x128xf32>
      tpu.vector_store %arg6[%c0_117, %c0_118], %144 {strides = array<i32>} : memref<8x128xf32, #tpu.memory_space<vmem>>, vector<8x128xf32>,
    } else {
    }
    return
  }
  func.func @transform_0(%arg0: i32, %arg1: i32, %arg2: memref<8xi32, #tpu.memory_space<smem>>) -> (i32, i32) {
    %c0_i32 = arith.constant 0 : i32
    %c0_i32_0 = arith.constant 0 : i32
    %c0_i32_1 = arith.constant 0 : i32
    return %c0_i32, %c0_i32_0 : i32, i32
  }
  func.func @transform_3(%arg0: i32, %arg1: i32, %arg2: memref<8xi32, #tpu.memory_space<smem>>) -> (i32, i32) {
    %c0_i32 = arith.constant 0 : i32
    %c0_i32_0 = arith.constant 0 : i32
    return %arg0, %c0_i32 : i32, i32
  }
  func.func @transform_4(%arg0: i32, %arg1: i32, %arg2: memref<8xi32, #tpu.memory_space<smem>>) -> (i32, i32) {
    %c0_i32 = arith.constant 0 : i32
    %c0_i32_0 = arith.constant 0 : i32
    return %arg0, %c0_i32 : i32, i32
  }
}

</mosaic_0001>

<bundles_post_ra>
// kernel: tpu_custom_call.1
= control target key start
LH: loop header
LB: loop body
LE: loop exit
PB: predicated region body
PF: predicated region fallthrough
CT: control target
= control target key end

     0   :  { %s1834_s0 = inlined_call_operand.hbm [shape: s32[8], index: 0, kind: input, shape index: {}]   ;;  %s1835_s1 = inlined_call_operand.vmem [shape: s32[1,128], index: 1, kind: input, shape index: {}]   ;;  %s1836_s2 = inlined_call_operand.hbm [shape: f32[16,128], index: 2, kind: input, shape index: {}]   ;;  %s1837_s3 = inlined_call_operand.hbm [shape: f32[16,128], index: 3, kind: input, shape index: {}]   ;;  %s1838_s4 = inlined_call_operand.hbm [shape: f32[8,128], index: 4, kind: output, shape index: {0}]   ;;  %s1839_s5 = inlined_call_operand.hbm [shape: f32[8,128], index: 5, kind: output, shape index: {1}]  }
   0x1   :  { %s789_s20 = scalar_lea.hbm %s1834_s0, 16 }
   0x2   :  { %p790_p0 = scmp.ne.s32.totalorder %s1834_s0, %s789_s20  ;;  %p793_p1 = scmp.lt.u32.totalorder %s789_s20, %s1834_s0 }
   0x4   :  { %p795_p2 = pnand %p793_p1, %p790_p0 }
   0x6   :  { %798 = shalt.err (!%p795_p2)  }
   0x7   :  { %s1265_s25 = smov [#allocation7]  }
   0x8   :  { %12 = dma.hbm_to_smem %s1834_s0, 16, %s1265_s25, [#allocation6] }
   0x9   :  { %1227 = dma.done.wait [#allocation6], 16 }
   0xa   :  { %1228 = vsyncadd [#allocation6], 4294967280 }
   0xb   :  { %14 = sfence }
   0xc   :  { %15 = vsyncpa [#allocation9], 0 }
   0xd   :  { %16 = vsyncpa [#allocation11], 0  ;;  %s1329_s28 = sld [smem:[#allocation7]]  ;;  %v296_v0 = vlaneseq  ;;  %s1266_s29 = smov [#allocation3]   ;;  %v1267_v1 = vmov 0.0  }
   0xe   :  { %s35_s30 = sshll.u32 %s1266_s29, 4  ;;  %295 = vst [vmem:[#allocation10] sm:$0xff] %v1267_v1  ;;  %s1268_s6 = smov [#allocation2]   ;;  %v1343_v3 = vld [vmem:[%s1835_s1] ss:$0 sm:$0xff]  ;;  %s1332_s30 = int_to_ptr.vmem [resolvable:$true] %s35_s30 }
   0xf   :  { %s179_s7 = sshll.u32 %s1268_s6, 4  ;;  %v1334_v2 = vshrl.u32 %v296_v0, 7  ;;  %s1338_s0 = sld [smem:[#allocation7 + $0x1]]  ;;  %s1336_s7 = int_to_ptr.vmem [resolvable:$true] %s179_s7 }
  0x10   :  { %s1269_s10 = smov [#allocation3 + $0x1]   ;;  %s1270_s12 = smov [#allocation2 + $0x1]  }
  0x11   :  { %v1346_v4 = vadd.s32 8, %v1334_v2  ;;  %v1349_v5 = vadd.s32 16, %v1334_v2  ;;  %v1352_v6 = vadd.s32 24, %v1334_v2  ;;  %v1355_v7 = vadd.s32 32, %v1334_v2  ;;  %s53_s11 = sshll.u32 %s1269_s10, 4  ;;  %s1357_s13 = sshll.u32 %s1270_s12, 4  ;;  %s1372_s11 = int_to_ptr.vmem [resolvable:$true] %s53_s11  ;;  %s1464_s13 = int_to_ptr.vmem [resolvable:$true] %s1357_s13 }
  0x12   :  { %v1360_v8 = vadd.s32 40, %v1334_v2  ;;  %v1363_v9 = vadd.s32 48, %v1334_v2  ;;  %v1366_v10 = vadd.s32 56, %v1334_v2  ;;  %v1369_v11 = vadd.s32 64, %v1334_v2  ;;  %s1408_s23 = scalar_lea.hbm %s1837_s3, 256 }
  0x13   :  { %s659_s1 = sshll.u32 %s1329_s28, 4  ;;  %v1375_v12 = vadd.s32 72, %v1334_v2  ;;  %v1378_v13 = vadd.s32 80, %v1334_v2  ;;  %v1381_v14 = vadd.s32 88, %v1334_v2  ;;  %v1384_v15 = vadd.s32 96, %v1334_v2 }
  0x14   :  { %s27_s16 = scalar_lea.hbm %s1837_s3, %s659_s1  ;;  %s1392_s19 = scalar_lea.hbm %s1836_s2, %s659_s1  ;;  %v1395_v16 = vadd.s32 104, %v1334_v2  ;;  %v1398_v17 = vadd.s32 112, %v1334_v2  ;;  %v1401_v18 = vadd.s32 120, %v1334_v2  ;;  %vm335_vm0 = vcmp.eq.s32.totalorder %v1334_v2, %v1343_v3 }
  0x15   :  { %s799_s20 = scalar_lea.hbm %s27_s16, 16  ;;  %p802_p4 = scmp.lt.u32.totalorder %s27_s16, %s1837_s3 }
  0x16   :  { %p800_p3 = scmp.ne.s32.totalorder %s27_s16, %s799_s20  ;;  %p803_p5 = scmp.lt.u32.totalorder %s1408_s23, %s799_s20 }
  0x17   :  { %p805_p7 = scmp.lt.u32.totalorder %s799_s20, %s27_s16 }
  0x18   :  { %p804_p6 = por %p803_p5, %p802_p4 }
  0x1a   :  { %p806_p8 = por %p805_p7, %p804_p6 }
  0x1c   :  { %p807_p9 = pnand %p806_p8, %p800_p3 }
  0x1e   :  { %810 = shalt.err (!%p807_p9)  }
  0x1f   :  { %s811_s26 = scalar_lea.vmem %s1332_s30, 16  ;;  %s1417_s27 = scalar_lea.vmem %s1332_s30, 128 }
  0x20   :  { %p812_p10 = scmp.ne.s32.totalorder %s1332_s30, %s811_s26  ;;  %p816_p11 = scmp.lt.s32.totalorder %s1332_s30, %s1332_s30 }
  0x21   :  { %p817_p12 = scmp.lt.s32.totalorder %s1417_s27, %s811_s26 }
  0x23   :  { %p818_p13 = por %p817_p12, %p816_p11 }
  0x25   :  { %p819_p0 = pnand %p818_p13, %p812_p10 }
  0x27   :  { %822 = shalt.err (!%p819_p0)  }
  0x28   :  { %38 = dma.hbm_to_vmem [thread:$0]  %s27_s16, 16, %s1332_s30, [#allocation5]  ;;  %vm336_vm1 = vcmp.eq.s32.totalorder %v1346_v4, %v1343_v3  ;;  %vm337_vm2 = vcmp.eq.s32.totalorder %v1349_v5, %v1343_v3  ;;  %vm338_vm3 = vcmp.eq.s32.totalorder %v1352_v6, %v1343_v3  ;;  %vm339_vm4 = vcmp.eq.s32.totalorder %v1355_v7, %v1343_v3 }
  0x29   :  { %s823_s28 = scalar_lea.hbm %s1392_s19, 16  ;;  %s1436_s8 = scalar_lea.hbm %s1836_s2, 256 }
  0x2a   :  { %p824_p1 = scmp.ne.s32.totalorder %s1392_s19, %s823_s28  ;;  %p826_p2 = scmp.lt.u32.totalorder %s1392_s19, %s1836_s2 }
  0x2b   :  { %p827_p3 = scmp.lt.u32.totalorder %s1436_s8, %s823_s28  ;;  %p829_p5 = scmp.lt.u32.totalorder %s823_s28, %s1392_s19 }
  0x2d   :  { %p828_p4 = por %p827_p3, %p826_p2 }
  0x2f   :  { %p830_p6 = por %p829_p5, %p828_p4 }
  0x31   :  { %p831_p7 = pnand %p830_p6, %p824_p1 }
  0x33   :  { %834 = shalt.err (!%p831_p7)  }
  0x34   :  { %s835_s12 = scalar_lea.vmem %s1336_s7, 16  ;;  %s1447_s1 = scalar_lea.vmem %s1336_s7, 128 }
  0x35   :  { %p836_p8 = scmp.ne.s32.totalorder %s1336_s7, %s835_s12  ;;  %p840_p9 = scmp.lt.s32.totalorder %s1336_s7, %s1336_s7 }
  0x36   :  { %p841_p10 = scmp.lt.s32.totalorder %s1447_s1, %s835_s12 }
  0x38   :  { %p842_p11 = por %p841_p10, %p840_p9 }
  0x3a   :  { %p843_p12 = pnand %p842_p11, %p836_p8 }
  0x3c   :  { %846 = shalt.err (!%p843_p12)  }
  0x3d   :  { %182 = dma.hbm_to_vmem [thread:$0]  %s1392_s19, 16, %s1336_s7, [#allocation4]  ;;  %vm340_vm5 = vcmp.eq.s32.totalorder %v1360_v8, %v1343_v3  ;;  %vm341_vm6 = vcmp.eq.s32.totalorder %v1363_v9, %v1343_v3  ;;  %vm342_vm7 = vcmp.eq.s32.totalorder %v1366_v10, %v1343_v3  ;;  %vm343_vm8 = vcmp.eq.s32.totalorder %v1369_v11, %v1343_v3 }
  0x3e   :  { %s661_s14 = sshll.u32 %s1338_s0, 4  ;;  %vm344_vm9 = vcmp.eq.s32.totalorder %v1375_v12, %v1343_v3  ;;  %vm345_vm10 = vcmp.eq.s32.totalorder %v1378_v13, %v1343_v3  ;;  %vm346_vm11 = vcmp.eq.s32.totalorder %v1381_v14, %v1343_v3  ;;  %vm347_vm12 = vcmp.eq.s32.totalorder %v1384_v15, %v1343_v3 }
  0x3f   :  { %s43_s17 = scalar_lea.hbm %s1837_s3, %s661_s14  ;;  %s1480_s19 = scalar_lea.hbm %s1836_s2, %s661_s14 }
  0x40   :  { %s847_s20 = scalar_lea.hbm %s43_s17, 16  ;;  %p850_p0 = scmp.lt.u32.totalorder %s43_s17, %s1837_s3 }
  0x41   :  { %p848_p13 = scmp.ne.s32.totalorder %s43_s17, %s847_s20  ;;  %p851_p1 = scmp.lt.u32.totalorder %s1408_s23, %s847_s20 }
  0x42   :  { %p853_p3 = scmp.lt.u32.totalorder %s847_s20, %s43_s17 }
  0x43   :  { %p852_p2 = por %p851_p1, %p850_p0 }
  0x45   :  { %p854_p4 = por %p853_p3, %p852_p2 }
  0x47   :  { %p855_p5 = pnand %p854_p4, %p848_p13 }
  0x49   :  { %858 = shalt.err (!%p855_p5)  }
  0x4a   :  { %s859_s24 = scalar_lea.vmem %s1372_s11, 16  ;;  %p864_p7 = scmp.lt.s32.totalorder %s1372_s11, %s1332_s30 }
  0x4b   :  { %p860_p6 = scmp.ne.s32.totalorder %s1372_s11, %s859_s24  ;;  %p865_p8 = scmp.lt.s32.totalorder %s1417_s27, %s859_s24 }
  0x4d   :  { %p866_p9 = por %p865_p8, %p864_p7 }
  0x4f   :  { %p867_p10 = pnand %p866_p9, %p860_p6 }
  0x51   :  { %870 = shalt.err (!%p867_p10)  }
  0x52   :  { %56 = dma.hbm_to_vmem [thread:$0]  %s43_s17, 16, %s1372_s11, [#allocation5 + $0x1] }
  0x53   :  { %s871_s25 = scalar_lea.hbm %s1480_s19, 16  ;;  %p874_p12 = scmp.lt.u32.totalorder %s1480_s19, %s1836_s2 }
  0x54   :  { %p872_p11 = scmp.ne.s32.totalorder %s1480_s19, %s871_s25  ;;  %p875_p13 = scmp.lt.u32.totalorder %s1436_s8, %s871_s25 }
  0x55   :  { %p877_p1 = scmp.lt.u32.totalorder %s871_s25, %s1480_s19 }
  0x56   :  { %p876_p0 = por %p875_p13, %p874_p12 }
  0x58   :  { %p878_p2 = por %p877_p1, %p876_p0 }
  0x5a   :  { %p879_p3 = pnand %p878_p2, %p872_p11 }
  0x5c   :  { %882 = shalt.err (!%p879_p3)  }
  0x5d   :  { %s883_s29 = scalar_lea.vmem %s1464_s13, 16  ;;  %p888_p5 = scmp.lt.s32.totalorder %s1464_s13, %s1336_s7 }
  0x5e   :  { %p884_p4 = scmp.ne.s32.totalorder %s1464_s13, %s883_s29  ;;  %p889_p6 = scmp.lt.s32.totalorder %s1447_s1, %s883_s29 }
  0x60   :  { %p890_p7 = por %p889_p6, %p888_p5 }
  0x62   :  { %p891_p8 = pnand %p890_p7, %p884_p4 }
  0x64   :  { %894 = shalt.err (!%p891_p8)  }
  0x65   :  { %198 = dma.hbm_to_vmem [thread:$0]  %s1480_s19, 16, %s1464_s13, [#allocation4 + $0x1] }
  0x66   :  { %s662_s11 = sld [smem:[#allocation7 + $0x2]]  ;;  %s1271_s6 = smov [#allocation3 + $0x2]  }
  0x67   :  { %s71_s9 = sshll.u32 %s1271_s6, 4  ;;  %s1272_s10 = smov [#allocation2 + $0x2]   ;;  %s1513_s9 = int_to_ptr.vmem [resolvable:$true] %s71_s9 }
  0x68   :  { %s211_s12 = sshll.u32 %s1272_s10, 4  ;;  %s1517_s14 = sld [smem:[#allocation7 + $0x3]]  ;;  %s1515_s12 = int_to_ptr.vmem [resolvable:$true] %s211_s12 }
  0x69   :  { %s1273_s15 = smov [#allocation3 + $0x3]   ;;  %s1274_s17 = smov [#allocation2 + $0x3]  }
  0x6a   :  { %s89_s16 = sshll.u32 %s1273_s15, 4  ;;  %s1519_s18 = sshll.u32 %s1274_s17, 4  ;;  %s1521_s16 = int_to_ptr.vmem [resolvable:$true] %s89_s16  ;;  %s1558_s18 = int_to_ptr.vmem [resolvable:$true] %s1519_s18 }
  0x6c   :  { %s663_s0 = sshll.u32 %s662_s11, 4 }
  0x6d   :  { %s61_s20 = scalar_lea.hbm %s1837_s3, %s663_s0  ;;  %s1529_s24 = scalar_lea.hbm %s1836_s2, %s663_s0 }
  0x6e   :  { %s895_s25 = scalar_lea.hbm %s61_s20, 16  ;;  %p898_p10 = scmp.lt.u32.totalorder %s61_s20, %s1837_s3 }
  0x6f   :  { %p896_p9 = scmp.ne.s32.totalorder %s61_s20, %s895_s25  ;;  %p899_p11 = scmp.lt.u32.totalorder %s1408_s23, %s895_s25 }
  0x70   :  { %p901_p13 = scmp.lt.u32.totalorder %s895_s25, %s61_s20 }
  0x71   :  { %p900_p12 = por %p899_p11, %p898_p10 }
  0x73   :  { %p902_p0 = por %p901_p13, %p900_p12 }
  0x75   :  { %p903_p1 = pnand %p902_p0, %p896_p9 }
  0x77   :  { %906 = shalt.err (!%p903_p1)  }
  0x78   :  { %s907_s29 = scalar_lea.vmem %s1513_s9, 16  ;;  %p912_p3 = scmp.lt.s32.totalorder %s1513_s9, %s1332_s30 }
  0x79   :  { %p908_p2 = scmp.ne.s32.totalorder %s1513_s9, %s907_s29  ;;  %p913_p4 = scmp.lt.s32.totalorder %s1417_s27, %s907_s29 }
  0x7b   :  { %p914_p5 = por %p913_p4, %p912_p3 }
  0x7d   :  { %p915_p6 = pnand %p914_p5, %p908_p2 }
  0x7f   :  { %918 = shalt.err (!%p915_p6)  }
  0x80   :  { %74 = dma.hbm_to_vmem [thread:$0]  %s61_s20, 16, %s1513_s9, [#allocation5 + $0x2] }
  0x81   :  { %s919_s11 = scalar_lea.hbm %s1529_s24, 16  ;;  %p922_p8 = scmp.lt.u32.totalorder %s1529_s24, %s1836_s2 }
  0x82   :  { %p920_p7 = scmp.ne.s32.totalorder %s1529_s24, %s919_s11  ;;  %p923_p9 = scmp.lt.u32.totalorder %s1436_s8, %s919_s11 }
  0x83   :  { %p925_p11 = scmp.lt.u32.totalorder %s919_s11, %s1529_s24 }
  0x84   :  { %p924_p10 = por %p923_p9, %p922_p8 }
  0x86   :  { %p926_p12 = por %p925_p11, %p924_p10 }
  0x88   :  { %p927_p13 = pnand %p926_p12, %p920_p7 }
  0x8a   :  { %930 = shalt.err (!%p927_p13)  }
  0x8b   :  { %s931_s15 = scalar_lea.vmem %s1515_s12, 16  ;;  %p936_p1 = scmp.lt.s32.totalorder %s1515_s12, %s1336_s7 }
  0x8c   :  { %p932_p0 = scmp.ne.s32.totalorder %s1515_s12, %s931_s15  ;;  %p937_p2 = scmp.lt.s32.totalorder %s1447_s1, %s931_s15 }
  0x8e   :  { %p938_p3 = por %p937_p2, %p936_p1 }
  0x90   :  { %p939_p4 = pnand %p938_p3, %p932_p0 }
  0x92   :  { %942 = shalt.err (!%p939_p4)  }
  0x93   :  { %214 = dma.hbm_to_vmem [thread:$0]  %s1529_s24, 16, %s1515_s12, [#allocation4 + $0x2] }
  0x94   :  { %s665_s9 = sshll.u32 %s1517_s14, 4 }
  0x95   :  { %s79_s13 = scalar_lea.hbm %s1837_s3, %s665_s9  ;;  %s1566_s21 = scalar_lea.hbm %s1836_s2, %s665_s9 }
  0x96   :  { %s943_s22 = scalar_lea.hbm %s79_s13, 16  ;;  %p946_p6 = scmp.lt.u32.totalorder %s79_s13, %s1837_s3 }
  0x97   :  { %p944_p5 = scmp.ne.s32.totalorder %s79_s13, %s943_s22  ;;  %p947_p7 = scmp.lt.u32.totalorder %s1408_s23, %s943_s22 }
  0x98   :  { %p949_p9 = scmp.lt.u32.totalorder %s943_s22, %s79_s13 }
  0x99   :  { %p948_p8 = por %p947_p7, %p946_p6 }
  0x9b   :  { %p950_p10 = por %p949_p9, %p948_p8 }
  0x9d   :  { %p951_p11 = pnand %p950_p10, %p944_p5 }
  0x9f   :  { %954 = shalt.err (!%p951_p11)  }
  0xa0   :  { %s955_s12 = scalar_lea.vmem %s1521_s16, 16  ;;  %p960_p13 = scmp.lt.s32.totalorder %s1521_s16, %s1332_s30 }
  0xa1   :  { %p956_p12 = scmp.ne.s32.totalorder %s1521_s16, %s955_s12  ;;  %p961_p0 = scmp.lt.s32.totalorder %s1417_s27, %s955_s12 }
  0xa3   :  { %p962_p1 = por %p961_p0, %p960_p13 }
  0xa5   :  { %p963_p2 = pnand %p962_p1, %p956_p12 }
  0xa7   :  { %966 = shalt.err (!%p963_p2)  }
  0xa8   :  { %92 = dma.hbm_to_vmem [thread:$0]  %s79_s13, 16, %s1521_s16, [#allocation5 + $0x3] }
  0xa9   :  { %s967_s14 = scalar_lea.hbm %s1566_s21, 16  ;;  %p970_p4 = scmp.lt.u32.totalorder %s1566_s21, %s1836_s2 }
  0xaa   :  { %p968_p3 = scmp.ne.s32.totalorder %s1566_s21, %s967_s14  ;;  %p971_p5 = scmp.lt.u32.totalorder %s1436_s8, %s967_s14 }
  0xab   :  { %p973_p7 = scmp.lt.u32.totalorder %s967_s14, %s1566_s21 }
  0xac   :  { %p972_p6 = por %p971_p5, %p970_p4 }
  0xae   :  { %p974_p8 = por %p973_p7, %p972_p6 }
  0xb0   :  { %p975_p9 = pnand %p974_p8, %p968_p3 }
  0xb2   :  { %978 = shalt.err (!%p975_p9)  }
  0xb3   :  { %s979_s29 = scalar_lea.vmem %s1558_s18, 16  ;;  %p984_p11 = scmp.lt.s32.totalorder %s1558_s18, %s1336_s7 }
  0xb4   :  { %p980_p10 = scmp.ne.s32.totalorder %s1558_s18, %s979_s29  ;;  %p985_p12 = scmp.lt.s32.totalorder %s1447_s1, %s979_s29 }
  0xb6   :  { %p986_p13 = por %p985_p12, %p984_p11 }
  0xb8   :  { %p987_p0 = pnand %p986_p13, %p980_p10 }
  0xba   :  { %990 = shalt.err (!%p987_p0)  }
  0xbb   :  { %230 = dma.hbm_to_vmem [thread:$0]  %s1566_s21, 16, %s1558_s18, [#allocation4 + $0x3] }
  0xbc   :  { %s666_s16 = sld [smem:[#allocation7 + $0x4]]  ;;  %s1275_s11 = smov [#allocation3 + $0x4]  }
  0xbd   :  { %s107_s6 = sshll.u32 %s1275_s11, 4  ;;  %s1276_s10 = smov [#allocation2 + $0x4]   ;;  %s1593_s6 = int_to_ptr.vmem [resolvable:$true] %s107_s6 }
  0xbe   :  { %s243_s15 = sshll.u32 %s1276_s10, 4  ;;  %s1597_s9 = sld [smem:[#allocation7 + $0x5]]  ;;  %s1595_s15 = int_to_ptr.vmem [resolvable:$true] %s243_s15 }
  0xbf   :  { %s1277_s17 = smov [#allocation3 + $0x5]   ;;  %s1278_s13 = smov [#allocation2 + $0x5]  }
  0xc0   :  { %s125_s0 = sshll.u32 %s1277_s17, 4  ;;  %s1599_s19 = sshll.u32 %s1278_s13, 4  ;;  %s1601_s0 = int_to_ptr.vmem [resolvable:$true] %s125_s0  ;;  %s1638_s19 = int_to_ptr.vmem [resolvable:$true] %s1599_s19 }
  0xc2   :  { %s667_s20 = sshll.u32 %s666_s16, 4 }
  0xc3   :  { %s97_s22 = scalar_lea.hbm %s1837_s3, %s667_s20  ;;  %s1609_s12 = scalar_lea.hbm %s1836_s2, %s667_s20 }
  0xc4   :  { %s991_s14 = scalar_lea.hbm %s97_s22, 16  ;;  %p994_p2 = scmp.lt.u32.totalorder %s97_s22, %s1837_s3 }
  0xc5   :  { %p992_p1 = scmp.ne.s32.totalorder %s97_s22, %s991_s14  ;;  %p995_p3 = scmp.lt.u32.totalorder %s1408_s23, %s991_s14 }
  0xc6   :  { %p997_p5 = scmp.lt.u32.totalorder %s991_s14, %s97_s22 }
  0xc7   :  { %p996_p4 = por %p995_p3, %p994_p2 }
  0xc9   :  { %p998_p6 = por %p997_p5, %p996_p4 }
  0xcb   :  { %p999_p7 = pnand %p998_p6, %p992_p1 }
  0xcd   :  { %1002 = shalt.err (!%p999_p7)  }
  0xce   :  { %s1003_s29 = scalar_lea.vmem %s1593_s6, 16  ;;  %p1008_p9 = scmp.lt.s32.totalorder %s1593_s6, %s1332_s30 }
  0xcf   :  { %p1004_p8 = scmp.ne.s32.totalorder %s1593_s6, %s1003_s29  ;;  %p1009_p10 = scmp.lt.s32.totalorder %s1417_s27, %s1003_s29 }
  0xd1   :  { %p1010_p11 = por %p1009_p10, %p1008_p9 }
  0xd3   :  { %p1011_p12 = pnand %p1010_p11, %p1004_p8 }
  0xd5   :  { %1014 = shalt.err (!%p1011_p12)  }
  0xd6   :  { %110 = dma.hbm_to_vmem [thread:$0]  %s97_s22, 16, %s1593_s6, [#allocation5 + $0x4] }
  0xd7   :  { %s1015_s16 = scalar_lea.hbm %s1609_s12, 16  ;;  %p1018_p0 = scmp.lt.u32.totalorder %s1609_s12, %s1836_s2 }
  0xd8   :  { %p1016_p13 = scmp.ne.s32.totalorder %s1609_s12, %s1015_s16  ;;  %p1019_p1 = scmp.lt.u32.totalorder %s1436_s8, %s1015_s16 }
  0xd9   :  { %p1021_p3 = scmp.lt.u32.totalorder %s1015_s16, %s1609_s12 }
  0xda   :  { %p1020_p2 = por %p1019_p1, %p1018_p0 }
  0xdc   :  { %p1022_p4 = por %p1021_p3, %p1020_p2 }
  0xde   :  { %p1023_p5 = pnand %p1022_p4, %p1016_p13 }
  0xe0   :  { %1026 = shalt.err (!%p1023_p5)  }
  0xe1   :  { %s1027_s17 = scalar_lea.vmem %s1595_s15, 16  ;;  %p1032_p7 = scmp.lt.s32.totalorder %s1595_s15, %s1336_s7 }
  0xe2   :  { %p1028_p6 = scmp.ne.s32.totalorder %s1595_s15, %s1027_s17  ;;  %p1033_p8 = scmp.lt.s32.totalorder %s1447_s1, %s1027_s17 }
  0xe4   :  { %p1034_p9 = por %p1033_p8, %p1032_p7 }
  0xe6   :  { %p1035_p10 = pnand %p1034_p9, %p1028_p6 }
  0xe8   :  { %1038 = shalt.err (!%p1035_p10)  }
  0xe9   :  { %246 = dma.hbm_to_vmem [thread:$0]  %s1609_s12, 16, %s1595_s15, [#allocation4 + $0x4] }
  0xea   :  { %s669_s6 = sshll.u32 %s1597_s9, 4 }
  0xeb   :  { %s115_s18 = scalar_lea.hbm %s1837_s3, %s669_s6  ;;  %s1646_s25 = scalar_lea.hbm %s1836_s2, %s669_s6 }
  0xec   :  { %s1039_s26 = scalar_lea.hbm %s115_s18, 16  ;;  %p1042_p12 = scmp.lt.u32.totalorder %s115_s18, %s1837_s3 }
  0xed   :  { %p1040_p11 = scmp.ne.s32.totalorder %s115_s18, %s1039_s26  ;;  %p1043_p13 = scmp.lt.u32.totalorder %s1408_s23, %s1039_s26 }
  0xee   :  { %p1045_p1 = scmp.lt.u32.totalorder %s1039_s26, %s115_s18 }
  0xef   :  { %p1044_p0 = por %p1043_p13, %p1042_p12 }
  0xf1   :  { %p1046_p2 = por %p1045_p1, %p1044_p0 }
  0xf3   :  { %p1047_p3 = pnand %p1046_p2, %p1040_p11 }
  0xf5   :  { %1050 = shalt.err (!%p1047_p3)  }
  0xf6   :  { %s1051_s15 = scalar_lea.vmem %s1601_s0, 16  ;;  %p1056_p5 = scmp.lt.s32.totalorder %s1601_s0, %s1332_s30 }
  0xf7   :  { %p1052_p4 = scmp.ne.s32.totalorder %s1601_s0, %s1051_s15  ;;  %p1057_p6 = scmp.lt.s32.totalorder %s1417_s27, %s1051_s15 }
  0xf9   :  { %p1058_p7 = por %p1057_p6, %p1056_p5 }
  0xfb   :  { %p1059_p8 = pnand %p1058_p7, %p1052_p4 }
  0xfd   :  { %1062 = shalt.err (!%p1059_p8)  }
  0xfe   :  { %128 = dma.hbm_to_vmem [thread:$0]  %s115_s18, 16, %s1601_s0, [#allocation5 + $0x5] }
  0xff   :  { %s1063_s9 = scalar_lea.hbm %s1646_s25, 16  ;;  %p1066_p10 = scmp.lt.u32.totalorder %s1646_s25, %s1836_s2 }
 0x100   :  { %p1064_p9 = scmp.ne.s32.totalorder %s1646_s25, %s1063_s9  ;;  %p1067_p11 = scmp.lt.u32.totalorder %s1436_s8, %s1063_s9 }
 0x101   :  { %p1069_p13 = scmp.lt.u32.totalorder %s1063_s9, %s1646_s25 }
 0x102   :  { %p1068_p12 = por %p1067_p11, %p1066_p10 }
 0x104   :  { %p1070_p0 = por %p1069_p13, %p1068_p12 }
 0x106   :  { %p1071_p1 = pnand %p1070_p0, %p1064_p9 }
 0x108   :  { %1074 = shalt.err (!%p1071_p1)  }
 0x109   :  { %s1075_s29 = scalar_lea.vmem %s1638_s19, 16  ;;  %p1080_p3 = scmp.lt.s32.totalorder %s1638_s19, %s1336_s7 }
 0x10a   :  { %p1076_p2 = scmp.ne.s32.totalorder %s1638_s19, %s1075_s29  ;;  %p1081_p4 = scmp.lt.s32.totalorder %s1447_s1, %s1075_s29 }
 0x10c   :  { %p1082_p5 = por %p1081_p4, %p1080_p3 }
 0x10e   :  { %p1083_p6 = pnand %p1082_p5, %p1076_p2 }
 0x110   :  { %1086 = shalt.err (!%p1083_p6)  }
 0x111   :  { %262 = dma.hbm_to_vmem [thread:$0]  %s1646_s25, 16, %s1638_s19, [#allocation4 + $0x5] }
 0x112   :  { %s670_s0 = sld [smem:[#allocation7 + $0x6]]  ;;  %s1279_s16 = smov [#allocation3 + $0x6]  }
 0x113   :  { %s143_s11 = sshll.u32 %s1279_s16, 4  ;;  %s1280_s10 = smov [#allocation2 + $0x6]   ;;  %s1673_s11 = int_to_ptr.vmem [resolvable:$true] %s143_s11 }
 0x114   :  { %s275_s17 = sshll.u32 %s1280_s10, 4  ;;  %s1677_s6 = sld [smem:[#allocation7 + $0x7]]  ;;  %s1675_s17 = int_to_ptr.vmem [resolvable:$true] %s275_s17 }
 0x115   :  { %s1281_s13 = smov [#allocation3 + $0x7]   ;;  %s1282_s18 = smov [#allocation2 + $0x7]  }
 0x116   :  { %s161_s20 = sshll.u32 %s1281_s13, 4  ;;  %s1679_s21 = sshll.u32 %s1282_s18, 4  ;;  %s1681_s20 = int_to_ptr.vmem [resolvable:$true] %s161_s20  ;;  %s1718_s21 = int_to_ptr.vmem [resolvable:$true] %s1679_s21 }
 0x118   :  { %s671_s22 = sshll.u32 %s670_s0, 4 }
 0x119   :  { %s133_s26 = scalar_lea.hbm %s1837_s3, %s671_s22  ;;  %s1689_s15 = scalar_lea.hbm %s1836_s2, %s671_s22 }
 0x11a   :  { %s1087_s9 = scalar_lea.hbm %s133_s26, 16  ;;  %p1090_p8 = scmp.lt.u32.totalorder %s133_s26, %s1837_s3 }
 0x11b   :  { %p1088_p7 = scmp.ne.s32.totalorder %s133_s26, %s1087_s9  ;;  %p1091_p9 = scmp.lt.u32.totalorder %s1408_s23, %s1087_s9 }
 0x11c   :  { %p1093_p11 = scmp.lt.u32.totalorder %s1087_s9, %s133_s26 }
 0x11d   :  { %p1092_p10 = por %p1091_p9, %p1090_p8 }
 0x11f   :  { %p1094_p12 = por %p1093_p11, %p1092_p10 }
 0x121   :  { %p1095_p13 = pnand %p1094_p12, %p1088_p7 }
 0x123   :  { %1098 = shalt.err (!%p1095_p13)  }
 0x124   :  { %s1099_s29 = scalar_lea.vmem %s1673_s11, 16  ;;  %p1104_p1 = scmp.lt.s32.totalorder %s1673_s11, %s1332_s30 }
 0x125   :  { %p1100_p0 = scmp.ne.s32.totalorder %s1673_s11, %s1099_s29  ;;  %p1105_p2 = scmp.lt.s32.totalorder %s1417_s27, %s1099_s29 }
 0x127   :  { %p1106_p3 = por %p1105_p2, %p1104_p1 }
 0x129   :  { %p1107_p4 = pnand %p1106_p3, %p1100_p0 }
 0x12b   :  { %1110 = shalt.err (!%p1107_p4)  }
 0x12c   :  { %146 = dma.hbm_to_vmem [thread:$0]  %s133_s26, 16, %s1673_s11, [#allocation5 + $0x6] }
 0x12d   :  { %s1111_s0 = scalar_lea.hbm %s1689_s15, 16  ;;  %p1114_p6 = scmp.lt.u32.totalorder %s1689_s15, %s1836_s2 }
 0x12e   :  { %p1112_p5 = scmp.ne.s32.totalorder %s1689_s15, %s1111_s0  ;;  %p1115_p7 = scmp.lt.u32.totalorder %s1436_s8, %s1111_s0 }
 0x12f   :  { %p1117_p9 = scmp.lt.u32.totalorder %s1111_s0, %s1689_s15 }
 0x130   :  { %p1116_p8 = por %p1115_p7, %p1114_p6 }
 0x132   :  { %p1118_p10 = por %p1117_p9, %p1116_p8 }
 0x134   :  { %p1119_p11 = pnand %p1118_p10, %p1112_p5 }
 0x136   :  { %1122 = shalt.err (!%p1119_p11)  }
 0x137   :  { %s1123_s13 = scalar_lea.vmem %s1675_s17, 16  ;;  %p1128_p13 = scmp.lt.s32.totalorder %s1675_s17, %s1336_s7 }
 0x138   :  { %p1124_p12 = scmp.ne.s32.totalorder %s1675_s17, %s1123_s13  ;;  %p1129_p0 = scmp.lt.s32.totalorder %s1447_s1, %s1123_s13 }
 0x13a   :  { %p1130_p1 = por %p1129_p0, %p1128_p13 }
 0x13c   :  { %p1131_p2 = pnand %p1130_p1, %p1124_p12 }
 0x13e   :  { %1134 = shalt.err (!%p1131_p2)  }
 0x13f   :  { %278 = dma.hbm_to_vmem [thread:$0]  %s1689_s15, 16, %s1675_s17, [#allocation4 + $0x6] }
 0x140   :  { %s673_s11 = sshll.u32 %s1677_s6, 4 }
 0x141   :  { %s151_s19 = scalar_lea.hbm %s1837_s3, %s673_s11  ;;  %s1726_s14 = scalar_lea.hbm %s1836_s2, %s673_s11 }
 0x142   :  { %s1135_s24 = scalar_lea.hbm %s151_s19, 16  ;;  %p1138_p4 = scmp.lt.u32.totalorder %s151_s19, %s1837_s3 }
 0x143   :  { %p1136_p3 = scmp.ne.s32.totalorder %s151_s19, %s1135_s24  ;;  %p1139_p5 = scmp.lt.u32.totalorder %s1408_s23, %s1135_s24 }
 0x144   :  { %p1141_p7 = scmp.lt.u32.totalorder %s1135_s24, %s151_s19 }
 0x145   :  { %p1140_p6 = por %p1139_p5, %p1138_p4 }
 0x147   :  { %p1142_p8 = por %p1141_p7, %p1140_p6 }
 0x149   :  { %p1143_p9 = pnand %p1142_p8, %p1136_p3 }
 0x14b   :  { %1146 = shalt.err (!%p1143_p9)  }
 0x14c   :  { %s1147_s17 = scalar_lea.vmem %s1681_s20, 16  ;;  %p1152_p11 = scmp.lt.s32.totalorder %s1681_s20, %s1332_s30 }
 0x14d   :  { %p1148_p10 = scmp.ne.s32.totalorder %s1681_s20, %s1147_s17  ;;  %p1153_p12 = scmp.lt.s32.totalorder %s1417_s27, %s1147_s17 }
 0x14f   :  { %p1154_p13 = por %p1153_p12, %p1152_p11 }
 0x151   :  { %p1155_p0 = pnand %p1154_p13, %p1148_p10 }
 0x153   :  { %1158 = shalt.err (!%p1155_p0)  }
 0x154   :  { %164 = dma.hbm_to_vmem [thread:$0]  %s151_s19, 16, %s1681_s20, [#allocation5 + $0x7] }
 0x155   :  { %s1159_s3 = scalar_lea.hbm %s1726_s14, 16  ;;  %p1162_p2 = scmp.lt.u32.totalorder %s1726_s14, %s1836_s2 }
 0x156   :  { %p1160_p1 = scmp.ne.s32.totalorder %s1726_s14, %s1159_s3  ;;  %p1163_p3 = scmp.lt.u32.totalorder %s1436_s8, %s1159_s3 }
 0x157   :  { %p1165_p5 = scmp.lt.u32.totalorder %s1159_s3, %s1726_s14 }
 0x158   :  { %p1164_p4 = por %p1163_p3, %p1162_p2 }
 0x15a   :  { %p1166_p6 = por %p1165_p5, %p1164_p4 }
 0x15c   :  { %p1167_p7 = pnand %p1166_p6, %p1160_p1 }
 0x15e   :  { %1170 = shalt.err (!%p1167_p7)  }
 0x15f   :  { %s1171_s30 = scalar_lea.vmem %s1718_s21, 16  ;;  %p1176_p9 = scmp.lt.s32.totalorder %s1718_s21, %s1336_s7 }
 0x160   :  { %p1172_p8 = scmp.ne.s32.totalorder %s1718_s21, %s1171_s30  ;;  %p1177_p10 = scmp.lt.s32.totalorder %s1447_s1, %s1171_s30 }
 0x162   :  { %p1178_p11 = por %p1177_p10, %p1176_p9 }
 0x164   :  { %p1179_p12 = pnand %p1178_p11, %p1172_p8 }
 0x166   :  { %1182 = shalt.err (!%p1179_p12)  }
 0x167   :  { %294 = dma.hbm_to_vmem [thread:$0]  %s1726_s14, 16, %s1718_s21, [#allocation4 + $0x7] }
 0x168   :  { %1229 = dma.done.wait [#allocation5], 16 }
 0x169   :  { %1230 = vsyncadd [#allocation5], 4294967280 }
 0x16a   :  { %1231 = dma.done.wait [#allocation5 + $0x1], 16 }
 0x16b   :  { %1232 = vsyncadd [#allocation5 + $0x1], 4294967280 }
 0x16c   :  { %1233 = dma.done.wait [#allocation5 + $0x2], 16 }
 0x16d   :  { %1234 = vsyncadd [#allocation5 + $0x2], 4294967280 }
 0x16e   :  { %1235 = dma.done.wait [#allocation5 + $0x3], 16 }
 0x16f   :  { %1236 = vsyncadd [#allocation5 + $0x3], 4294967280 }
 0x170   :  { %1237 = dma.done.wait [#allocation5 + $0x4], 16 }
 0x171   :  { %1238 = vsyncadd [#allocation5 + $0x4], 4294967280 }
 0x172   :  { %1239 = dma.done.wait [#allocation5 + $0x5], 16 }
 0x173   :  { %1240 = vsyncadd [#allocation5 + $0x5], 4294967280 }
 0x174   :  { %1241 = dma.done.wait [#allocation5 + $0x6], 16 }
 0x175   :  { %1242 = vsyncadd [#allocation5 + $0x6], 4294967280  ;;  %747 = vmatprep.subr.bf16.mxu0 %v1267_v1  ;;  %v1283_v19 = vmov 1.0|1.0   ;;  %vm1284_vm14 = vmmov 0  }
 0x176   :  { %vm706_vm15 = vmpackc.low %vm336_vm1, %vm335_vm0  ;;  %763 = vmatprep.mubr.msk.bf16.mxu0 %vm1284_vm14, %v1267_v1 }
 0x177   :  { %748 = vmatpush3.bf16.msk.msra.mxu0 %vm706_vm15, %v1283_v19  ;;  %vm708_vm13 = vmpackc.low %vm338_vm3, %vm337_vm2 }
 0x178   :  { %749 = vmatprep.subr.bf16.mxu0 %v1267_v1  ;;  %vm710_vm0 = vmpackc.low %vm340_vm5, %vm339_vm4 }
 0x17b   :  { %750 = vmatpush3.bf16.msk.msra.mxu0 %vm708_vm13, %v1283_v19 }
 0x17c   :  { %751 = vmatprep.subr.bf16.mxu0 %v1267_v1 }
 0x17d   :  { %1243 = dma.done.wait [#allocation5 + $0x7], 16 }
 0x17e   :  { %1244 = vsyncadd [#allocation5 + $0x7], 4294967280  ;;  %vm1840_vm4 = vcmp.eq.s32.totalorder %v1395_v16, %v1343_v3  ;;  %v409_v20 = vld [vmem:[#allocation3] sm:$0xff]  ;;  %v408_v22 = vld [vmem:[#allocation10] sm:$0xff] }
 0x17f   :  { %752 = vmatpush3.bf16.msk.msra.mxu0 %vm710_vm0, %v1283_v19  ;;  %vm712_vm1 = vmpackc.low %vm342_vm7, %vm341_vm6  ;;  %vm1841_vm6 = vcmp.eq.s32.totalorder %v1398_v17, %v1343_v3  ;;  %vm1842_vm7 = vcmp.eq.s32.totalorder %v1401_v18, %v1343_v3  ;;  %v410_v21 = vpack.c.bf16 %v409_v20, %v409_v20 }
 0x180   :  { %753 = vmatprep.subr.bf16.mxu0 %v1267_v1  ;;  %vm714_vm2 = vmpackc.low %vm344_vm9, %vm343_vm8 }
 0x181   :  { %vm716_vm3 = vmpackc.low %vm346_vm11, %vm345_vm10 }
 0x182   :  { %vm718_vm5 = vmpackc.low %vm1840_vm4, %vm347_vm12 }
 0x183   :  { %754 = vmatpush3.bf16.msk.msra.mxu0 %vm712_vm1, %v1283_v19  ;;  %vm720_vm8 = vmpackc.low %vm1842_vm7, %vm1841_vm6 }
 0x184   :  { %755 = vmatprep.subr.bf16.mxu0 %v1267_v1 }
 0x187   :  { %756 = vmatpush3.bf16.msk.msra.mxu0 %vm714_vm2, %v1283_v19 }
 0x188   :  { %757 = vmatprep.subr.bf16.mxu0 %v1267_v1 }
 0x18b   :  { %758 = vmatpush3.bf16.msk.msra.mxu0 %vm716_vm3, %v1283_v19 }
 0x18c   :  { %759 = vmatprep.subr.bf16.mxu0 %v1267_v1 }
 0x18f   :  { %760 = vmatpush3.bf16.msk.msra.mxu0 %vm718_vm5, %v1283_v19 }
 0x190   :  { %761 = vmatprep.subr.bf16.mxu0 %v1267_v1 }
 0x193   :  { %762 = vmatpush3.bf16.msk.msra.mxu0 %vm720_vm8, %v1283_v19 }
 0x196   :  { %764 = vmatmul.mubr.bf16.vlgmr.msra.gmra.mrb[0].mxu0 %v410_v21 }
 0x269   :  { %v445_v23 = vpop.f32.mrb[0].mxu0 }
 0x26a   :  { %v451_v24 = vadd.f32 %v445_v23, %v408_v22  ;;  %v765_v25 = vpop.f32.mrb[1].mxu0 }
 0x26b   :  { %v448_v26 = vpop.f32.mrb[2].mxu0 }
 0x26c   :  { %452 = vst [vmem:[#allocation10] sm:$0xff] %v451_v24  ;;  %v766_v27 = vpop.f32.mrb[3].mxu0 }
 0x26d   :  { %1245 = dma.done.wait [#allocation4], 16 }
 0x26e   :  { %1246 = vsyncadd [#allocation4], 4294967280 }
 0x26f   :  { %1247 = dma.done.wait [#allocation4 + $0x1], 16 }
 0x270   :  { %1248 = vsyncadd [#allocation4 + $0x1], 4294967280 }
 0x271   :  { %1249 = dma.done.wait [#allocation4 + $0x2], 16 }
 0x272   :  { %1250 = vsyncadd [#allocation4 + $0x2], 4294967280 }
 0x273   :  { %1251 = dma.done.wait [#allocation4 + $0x3], 16 }
 0x274   :  { %1252 = vsyncadd [#allocation4 + $0x3], 4294967280 }
 0x275   :  { %1253 = dma.done.wait [#allocation4 + $0x4], 16 }
 0x276   :  { %1254 = vsyncadd [#allocation4 + $0x4], 4294967280 }
 0x277   :  { %1255 = dma.done.wait [#allocation4 + $0x5], 16 }
 0x278   :  { %1256 = vsyncadd [#allocation4 + $0x5], 4294967280 }
 0x279   :  { %1257 = dma.done.wait [#allocation4 + $0x6], 16 }
 0x27a   :  { %1258 = vsyncadd [#allocation4 + $0x6], 4294967280 }
 0x27b   :  { %1259 = dma.done.wait [#allocation4 + $0x7], 16 }
 0x27c   :  { %1260 = vsyncadd [#allocation4 + $0x7], 4294967280  ;;  %s1285_s2 = smov [#allocation10]   ;;  %s1286_s27 = smov [#allocation8]  }
 0x27d   :  { %s497_s7 = sshll.u32 %s1285_s2, 4  ;;  %s487_s8 = sshll.u32 %s1286_s27, 4  ;;  %s498_s7 = int_to_ptr.vmem [resolvable:$true] %s497_s7  ;;  %s488_s8 = int_to_ptr.vmem [resolvable:$true] %s487_s8 }
 0x27e   :  { %s1183_s1 = scalar_lea.vmem %s498_s7, 128  ;;  %p1188_p0 = scmp.lt.s32.totalorder %s498_s7, %s498_s7 }
 0x27f   :  { %p1184_p13 = scmp.ne.s32.totalorder %s498_s7, %s1183_s1  ;;  %p1189_p1 = scmp.lt.s32.totalorder %s1183_s1, %s1183_s1 }
 0x281   :  { %p1190_p2 = por %p1189_p1, %p1188_p0 }
 0x283   :  { %p1191_p3 = pnand %p1190_p2, %p1184_p13 }
 0x285   :  { %1194 = shalt.err (!%p1191_p3)
}
 0x286   :  { %s1195_s15 = scalar_lea.hbm %s1839_s5, 128 }
 0x287   :  { %p1196_p4 = scmp.ne.s32.totalorder %s1839_s5, %s1195_s15  ;;  %p1199_p5 = scmp.lt.u32.totalorder %s1195_s15, %s1839_s5 }
 0x289   :  { %p1201_p6 = pnand %p1199_p5, %p1196_p4 }
 0x28b   :  { %1204 = shalt.err (!%p1201_p6)
}
 0x28c   :  { %500 = dma.vmem_to_hbm [thread:$0]  %s498_s7, 128, %s1839_s5, [#allocation11]   ;;  %v479_v28 = vld [vmem:[#allocation2] sm:$0xff] }
 0x28d   :  { %480 = vst [vmem:[#allocation8] sm:$0xff] %v479_v28  ;;  %s1205_s11 = scalar_lea.vmem %s488_s8, 128  ;;  %p1210_p8 = scmp.lt.s32.totalorder %s488_s8, %s488_s8 }
 0x28e   :  { %p1206_p7 = scmp.ne.s32.totalorder %s488_s8, %s1205_s11  ;;  %p1211_p9 = scmp.lt.s32.totalorder %s1205_s11, %s1205_s11 }
 0x290   :  { %p1212_p10 = por %p1211_p9, %p1210_p8 }
 0x292   :  { %p1213_p11 = pnand %p1212_p10, %p1206_p7 }
 0x294   :  { %1216 = shalt.err (!%p1213_p11)
}
 0x295   :  { %s1217_s19 = scalar_lea.hbm %s1838_s4, 128 }
 0x296   :  { %p1218_p12 = scmp.ne.s32.totalorder %s1838_s4, %s1217_s19  ;;  %p1221_p13 = scmp.lt.u32.totalorder %s1217_s19, %s1838_s4 }
 0x298   :  { %p1223_p0 = pnand %p1221_p13, %p1218_p12 }
 0x29a   :  { %1226 = shalt.err (!%p1223_p0)
}
 0x29b   :  { %490 = dma.vmem_to_hbm [thread:$0]  %s488_s8, 128, %s1838_s4, [#allocation9]  }
 0x29c   :  { %1261 = dma.done.wait [#allocation9], 128  }
 0x29d   :  { %1262 = vsyncadd [#allocation9], 4294967168 }
 0x29e   :  { %1263 = dma.done.wait [#allocation11], 128  }
 0x29f   :  { %1264 = vsyncadd [#allocation11], 4294967168 }
 0x2a0   :  { %507 = vsyncpa [#allocation9], 1 }
 0x2a1   :  { %508 = vsyncpa [#allocation11], 1 }
 0x2a2   :  { %509 = vsyncmov [#allocation4] }
 0x2a5   :  { %s510_s12 = vpop.sfrf %509 }
 0x2a6   :  { %p722_p1 = scmp.ne.s32.totalorder %s510_s12, 0 }
 0x2a8   :  { %514 = shalt.err (%p722_p1)  }
 0x2a9   :  { %516 = vsyncmov [#allocation4 + $0x1] }
 0x2ac   :  { %s517_s17 = vpop.sfrf %516 }
 0x2ad   :  { %p723_p2 = scmp.ne.s32.totalorder %s517_s17, 0 }
 0x2af   :  { %521 = shalt.err (%p723_p2)  }
 0x2b0   :  { %523 = vsyncmov [#allocation4 + $0x2] }
 0x2b3   :  { %s524_s3 = vpop.sfrf %523 }
 0x2b4   :  { %p724_p3 = scmp.ne.s32.totalorder %s524_s3, 0 }
 0x2b6   :  { %528 = shalt.err (%p724_p3)  }
 0x2b7   :  { %530 = vsyncmov [#allocation4 + $0x3] }
 0x2ba   :  { %s531_s4 = vpop.sfrf %530 }
 0x2bb   :  { %p725_p4 = scmp.ne.s32.totalorder %s531_s4, 0 }
 0x2bd   :  { %535 = shalt.err (%p725_p4)  }
 0x2be   :  { %537 = vsyncmov [#allocation4 + $0x4] }
 0x2c1   :  { %s538_s23 = vpop.sfrf %537 }
 0x2c2   :  { %p726_p5 = scmp.ne.s32.totalorder %s538_s23, 0 }
 0x2c4   :  { %542 = shalt.err (%p726_p5)  }
 0x2c5   :  { %544 = vsyncmov [#allocation4 + $0x5] }
 0x2c8   :  { %s545_s6 = vpop.sfrf %544 }
 0x2c9   :  { %p727_p6 = scmp.ne.s32.totalorder %s545_s6, 0 }
 0x2cb   :  { %549 = shalt.err (%p727_p6)  }
 0x2cc   :  { %551 = vsyncmov [#allocation4 + $0x6] }
 0x2cf   :  { %s552_s30 = vpop.sfrf %551 }
 0x2d0   :  { %p728_p7 = scmp.ne.s32.totalorder %s552_s30, 0 }
 0x2d2   :  { %556 = shalt.err (%p728_p7)  }
 0x2d3   :  { %558 = vsyncmov [#allocation4 + $0x7] }
 0x2d6   :  { %s559_s2 = vpop.sfrf %558 }
 0x2d7   :  { %p729_p8 = scmp.ne.s32.totalorder %s559_s2, 0 }
 0x2d9   :  { %563 = shalt.err (%p729_p8)  }
 0x2da   :  { %564 = vsyncmov [#allocation5] }
 0x2dd   :  { %s565_s7 = vpop.sfrf %564 }
 0x2de   :  { %p730_p9 = scmp.ne.s32.totalorder %s565_s7, 0 }
 0x2e0   :  { %569 = shalt.err (%p730_p9)  }
 0x2e1   :  { %571 = vsyncmov [#allocation5 + $0x1] }
 0x2e4   :  { %s572_s27 = vpop.sfrf %571 }
 0x2e5   :  { %p731_p10 = scmp.ne.s32.totalorder %s572_s27, 0 }
 0x2e7   :  { %576 = shalt.err (%p731_p10)  }
 0x2e8   :  { %578 = vsyncmov [#allocation5 + $0x2] }
 0x2eb   :  { %s579_s8 = vpop.sfrf %578 }
 0x2ec   :  { %p732_p11 = scmp.ne.s32.totalorder %s579_s8, 0 }
 0x2ee   :  { %583 = shalt.err (%p732_p11)  }
 0x2ef   :  { %585 = vsyncmov [#allocation5 + $0x3] }
 0x2f2   :  { %s586_s1 = vpop.sfrf %585 }
 0x2f3   :  { %p733_p12 = scmp.ne.s32.totalorder %s586_s1, 0 }
 0x2f5   :  { %590 = shalt.err (%p733_p12)  }
 0x2f6   :  { %592 = vsyncmov [#allocation5 + $0x4] }
 0x2f9   :  { %s593_s20 = vpop.sfrf %592 }
 0x2fa   :  { %p734_p13 = scmp.ne.s32.totalorder %s593_s20, 0 }
 0x2fc   :  { %597 = shalt.err (%p734_p13)  }
 0x2fd   :  { %599 = vsyncmov [#allocation5 + $0x5] }
 0x300   :  { %s600_s21 = vpop.sfrf %599 }
 0x301   :  { %p735_p0 = scmp.ne.s32.totalorder %s600_s21, 0 }
 0x303   :  { %604 = shalt.err (%p735_p0)  }
 0x304   :  { %606 = vsyncmov [#allocation5 + $0x6] }
 0x307   :  { %s607_s15 = vpop.sfrf %606 }
 0x308   :  { %p736_p1 = scmp.ne.s32.totalorder %s607_s15, 0 }
 0x30a   :  { %611 = shalt.err (%p736_p1)  }
 0x30b   :  { %613 = vsyncmov [#allocation5 + $0x7] }
 0x30e   :  { %s614_s28 = vpop.sfrf %613 }
 0x30f   :  { %p737_p2 = scmp.ne.s32.totalorder %s614_s28, 0 }
 0x311   :  { %618 = shalt.err (%p737_p2)  }

</bundles_post_ra>
